<compile_context>
chip_gen: v7x
topology: tpu7x:2x2x1
jax: 0.10.0
libtpu: 0.0.40
codegen_flags: <defaults>
</compile_context>

<pallas_src>
import functools

import jax
import jax.numpy as jnp
import numpy as np
from jax.experimental import pallas as pl
from jax.experimental.pallas import tpu as pltpu


def _double_conv_kernel(p1_ref, w1_ref, t1_ref, w2_ref, t2_ref, o_ref,
                        y1pad_ref):
    """One (batch, H-tile) step of the fused (conv3x3 + BN + ReLU) x 2 block.

    p1_ref:    (1, (TH+2)*W, 9*Cin) bf16  conv1 im2col patches (+1 halo row each side)
    w1_ref:    (9*Cin, Cp) bf16           conv1 weights, BN1 scale pre-folded
    t1_ref:    (1, Cp) f32                conv1 folded shift
    w2_ref:    (9, Cp, Cp) bf16           conv2 per-tap weights, BN2 scale pre-folded
    t2_ref:    (1, Cp) f32                conv2 folded shift
    o_ref:     (1, TH, W, Cp) bf16        output tile (NHWC, lane-dense channels)
    y1pad_ref: (TH+2, W+2, Cp) bf16       VMEM scratch: conv1 output + zero halo
    """
    hj = pl.program_id(1)
    THp2, Wp2, Cp = y1pad_ref.shape
    TH, W = THp2 - 2, Wp2 - 2

    # ---- conv1 (+shift + ReLU) over TH+2 rows: one MXU matmul
    #      (2-row recompute halo; Dropout2d = identity in eval).
    y1 = jnp.dot(p1_ref[0], w1_ref[...], preferred_element_type=jnp.float32)
    y1 = jnp.maximum(y1 + t1_ref[...], 0.0).astype(jnp.bfloat16)

    # ---- stage into the persistent halo scratch: zero the W borders (cheap,
    #      2 columns) and rewrite the interior; no concatenate copies.
    zcol = jnp.zeros((THp2, 1, Cp), jnp.bfloat16)
    y1pad_ref[:, 0:1, :] = zcol                       # left zero column
    y1pad_ref[:, W + 1:W + 2, :] = zcol               # right zero column
    y1pad_ref[:, 1:W + 1, :] = y1.reshape(THp2, W, Cp)

    # Rows of y1 outside the image are conv2's zero padding (NOT relu(shift)).
    zrow = jnp.zeros((1, W, Cp), jnp.bfloat16)

    @pl.when(hj == 0)
    def _():
        y1pad_ref[0:1, 1:W + 1, :] = zrow

    @pl.when(hj == pl.num_programs(1) - 1)
    def _():
        y1pad_ref[THp2 - 1:THp2, 1:W + 1, :] = zrow

    # ---- conv2 (+shift + ReLU): 9 per-tap K=Cp matmuls on shifted windows,
    #      f32 accumulation.  No materialised 9x im2col patch.
    acc = jnp.zeros((TH * W, Cp), jnp.float32)
    for kh in range(3):
        for kw in range(3):
            lhs = y1pad_ref[kh:kh + TH, kw:kw + W, :].reshape(TH * W, Cp)
            acc = acc + jnp.dot(lhs, w2_ref[kh * 3 + kw],
                                preferred_element_type=jnp.float32)
    y2 = jnp.maximum(acc + t2_ref[...], 0.0)
    o_ref[0] = y2.reshape(TH, W, Cp).astype(o_ref.dtype)   # lane-dense bf16 store


def _fold_bn(bias, gamma, beta, running_mean, running_var, eps=1e-5):
    scale = gamma / jnp.sqrt(running_var + eps)
    shift = beta + scale * (bias - running_mean)
    return scale, shift


def _pick_tile_h(H, W, Cin, Cp, vmem_budget=24 * 1024 * 1024):
    """Largest divisor-of-H row tile whose per-step buffers fit the budget."""
    bytes_per_row = (2 * W * 9 * Cin * 2        # conv1 patch block (2 pipeline bufs)
                     + (W + 2) * Cp * 2         # y1 halo scratch (bf16)
                     + W * Cp * 4               # conv2 f32 accumulator
                     + 2 * W * Cp * 2)          # output block (2 pipeline bufs)
    th = max(1, min(H, vmem_budget // max(bytes_per_row, 1)))
    while H % th:
        th -= 1
    return th


@functools.partial(jax.jit, static_argnames=("tile_h",))
def double_conv_forward(x_nchw, params, *, tile_h=None):
    """Full DoubleConv forward. Input/output are NCHW (PyTorch convention)."""
    x = jnp.transpose(x_nchw, (0, 2, 3, 1))                 # NCHW -> NHWC
    N, H, W, Cin = x.shape
    Cout = params["w1"].shape[-1]
    Cp = ((Cout + 127) // 128) * 128                        # lane-dense channels
    # TODO(synk): for Cout >= 256, tile the output-channel dim at 256 to fill
    #             the 256-wide MXUs of v6e/v7x instead of a single Cp pass.

    TH = tile_h if tile_h is not None else _pick_tile_h(H, W, Cin, Cp)
    assert H % TH == 0, (H, TH)
    num_h = H // TH

    s1, t1 = _fold_bn(params["b1"], params["g1"], params["be1"],
                      params["m1"], params["v1"])
    s2, t2 = _fold_bn(params["b2"], params["g2"], params["be2"],
                      params["m2"], params["v2"])

    # BN scale folded into weights in f32, THEN pad channels to Cp, then bf16.
    # Padded output channels get zero weight columns AND zero shift -> exact
    # zeros, sliced off below (coupled invariant: keep padc() zero-padded).
    w1s = params["w1"] * s1                                  # (3,3,Cin,Cout) f32
    w1p = jnp.pad(w1s, ((0, 0), (0, 0), (0, 0), (0, Cp - Cout)))
    w1p = w1p.reshape(9 * Cin, Cp).astype(jnp.bfloat16)
    w2s = params["w2"] * s2                                  # (3,3,Cout,Cout) f32
    w2p = jnp.pad(w2s, ((0, 0), (0, 0), (0, Cp - Cout), (0, Cp - Cout)))
    w2p = w2p.reshape(9, Cp, Cp).astype(jnp.bfloat16)

    def padc(v):
        return jnp.pad(v, (0, Cp - Cout)).reshape(1, Cp).astype(jnp.float32)

    # conv1 im2col patch built wrapper-side (K = 9*Cin is tiny; this removes
    # the worst-lane-occupancy phase from the kernel).  Tap order (kh,kw,cin)
    # matches the (3,3,Cin,Cout).reshape(9*Cin, Cp) weight packing.
    xp = jnp.pad(x, ((0, 0), (1, 1), (1, 1), (0, 0)))        # spatial zero pad
    taps = [xp[:, kh:kh + H, kw:kw + W, :]
            for kh in range(3) for kw in range(3)]
    p1 = jnp.concatenate(taps, axis=-1).astype(jnp.bfloat16)  # (N, H, W, 9*Cin)
    # +1 zero row top/bottom: their conv1 output is overwritten with zeros
    # in-kernel (conv2's zero padding at the image boundary).
    p1 = jnp.pad(p1, ((0, 0), (1, 1), (0, 0), (0, 0)))       # (N, H+2, W, 9*Cin)
    # Pre-gather overlapping H tiles (2-row recompute halo), flatten rows.
    rows = jnp.arange(num_h)[:, None] * TH + jnp.arange(TH + 2)[None, :]
    p1_tiles = p1[:, rows].reshape(N * num_h, (TH + 2) * W, 9 * Cin)

    flops = 2 * N * H * W * Cp * 9 * (Cin + Cp)
    bytes_accessed = (p1_tiles.size * 2 + w1p.size * 2 + w2p.size * 2
                      + 2 * Cp * 4 * 2 + N * H * W * Cp * 2)

    out_nhwc = pl.pallas_call(
        _double_conv_kernel,
        out_shape=jax.ShapeDtypeStruct((N, H, W, Cp), jnp.bfloat16),
        grid=(N, num_h),
        in_specs=[
            pl.BlockSpec((1, (TH + 2) * W, 9 * Cin),
                         lambda n, j: (n * num_h + j, 0, 0)),
            pl.BlockSpec((9 * Cin, Cp), lambda n, j: (0, 0)),
            pl.BlockSpec((1, Cp), lambda n, j: (0, 0)),
            pl.BlockSpec((9, Cp, Cp), lambda n, j: (0, 0, 0)),
            pl.BlockSpec((1, Cp), lambda n, j: (0, 0)),
        ],
        out_specs=pl.BlockSpec((1, TH, W, Cp), lambda n, j: (n, j, 0, 0)),
        scratch_shapes=[pltpu.VMEM((TH + 2, W + 2, Cp), jnp.bfloat16)],
        compiler_params=pltpu.CompilerParams(
            dimension_semantics=("parallel", "parallel"),
            vmem_limit_bytes=32 * 1024 * 1024),
        cost_estimate=pl.CostEstimate(flops=flops, transcendentals=0,
                                      bytes_accessed=bytes_accessed),
    )(p1_tiles, w1p, padc(t1), w2p, padc(t2))

    # Wrapper-side layout plumbing (drop when the consumer is NHWC Pallas).
    y = out_nhwc[..., :Cout].astype(jnp.float32)             # drop lane padding
    return jnp.transpose(y, (0, 3, 1, 2))                    # NHWC -> NCHW


def _reference_double_conv(x_nchw, params):
    """Pure-JAX (XLA conv, f32) reference for correctness checking."""
    def block(x, w_hwio, b, g, be, m, v):
        y = jax.lax.conv_general_dilated(
            x, w_hwio, window_strides=(1, 1), padding="SAME",
            dimension_numbers=("NHWC", "HWIO", "NHWC"))
        y = y + b
        y = g * (y - m) / jnp.sqrt(v + 1e-5) + be
        return jnp.maximum(y, 0.0)

    x = jnp.transpose(x_nchw, (0, 2, 3, 1))
    y = block(x, params["w1"], params["b1"], params["g1"], params["be1"],
              params["m1"], params["v1"])
    y = block(y, params["w2"], params["b2"], params["g2"], params["be2"],
              params["m2"], params["v2"])
    return jnp.transpose(y, (0, 3, 1, 2))


def init_params(key, in_channels, out_channels):
    k1, k2, k3, k4 = jax.random.split(key, 4)
    fan1 = in_channels * 9
    fan2 = out_channels * 9
    w1 = jax.random.normal(k1, (3, 3, in_channels, out_channels), jnp.float32)
    w1 = w1 * jnp.sqrt(2.0 / fan1)
    w2 = jax.random.normal(k2, (3, 3, out_channels, out_channels), jnp.float32)
    w2 = w2 * jnp.sqrt(2.0 / fan2)
    b1 = 0.01 * jax.random.normal(k3, (out_channels,), jnp.float32)
    b2 = 0.01 * jax.random.normal(k4, (out_channels,), jnp.float32)
    ones = jnp.ones((out_channels,), jnp.float32)
    zeros = jnp.zeros((out_channels,), jnp.float32)
    return {
        "w1": w1, "b1": b1,
        "g1": ones, "be1": zeros, "m1": zeros, "v1": ones,  # BatchNorm2d defaults
        "w2": w2, "b2": b2,
        "g2": ones, "be2": zeros, "m2": zeros, "v2": ones,
    }


if __name__ == "__main__":
    N, Cin, Cout, H, W = 2, 4, 8, 16, 16

    key = jax.random.PRNGKey(0)
    kx, kp = jax.random.split(key)
    x = jax.random.normal(kx, (N, Cin, H, W), jnp.float32)   # NCHW, like PyTorch
    params = init_params(kp, Cin, Cout)

    ref = jax.block_until_ready(_reference_double_conv(x, params))

    # H-tiled path (2 tiles, exercises the 2-row recompute halo + row zeroing).
    out_tiled = jax.block_until_ready(double_conv_forward(x, params, tile_h=8))
    # Auto-picked tile (whole image at this small shape).
    out_auto = jax.block_until_ready(double_conv_forward(x, params))

    assert out_tiled.shape == (N, Cout, H, W), out_tiled.shape
    assert out_auto.shape == (N, Cout, H, W), out_auto.shape
    # bf16 matmul operands (f32 accumulation) -> loosened tolerance vs f32 ref.
    np.testing.assert_allclose(np.asarray(out_tiled), np.asarray(ref),
                               rtol=3e-2, atol=3e-2)
    np.testing.assert_allclose(np.asarray(out_auto), np.asarray(ref),
                               rtol=3e-2, atol=3e-2)

    print("KERNEL_OK")
</pallas_src>

<mosaic_0001>
module attributes {stable_mosaic.version = 11 : i64} {
  func.func @_double_conv_kernel(%arg0: i32, %arg1: i32, %arg2: memref<1x160x36xbf16, #tpu.memory_space<vmem>>, %arg3: memref<36x128xbf16, #tpu.memory_space<vmem>>, %arg4: memref<1x128xf32, #tpu.memory_space<vmem>>, %arg5: memref<9x128x128xbf16, #tpu.memory_space<vmem>>, %arg6: memref<1x128xf32, #tpu.memory_space<vmem>>, %arg7: memref<1x8x16x128xbf16, #tpu.memory_space<vmem>>, %arg8: memref<10x18x128xbf16, #tpu.memory_space<vmem>>) attributes {dimension_semantics = [#tpu.dimension_semantics<parallel>, #tpu.dimension_semantics<parallel>], iteration_bounds = array<i64: 2, 2>, scalar_prefetch = 0 : i64, scratch_operands = 1 : i64, tpu.core_type = #tpu.core_type<tc>, window_params = [{transform_indices = @transform_0, window_bounds = array<i64: 1, 160, 36>}, {pipeline_mode = #tpu.pipeline_mode<synchronous>, transform_indices = @transform_1, window_bounds = array<i64: 36, 128>}, {pipeline_mode = #tpu.pipeline_mode<synchronous>, transform_indices = @transform_2, window_bounds = array<i64: 1, 128>}, {pipeline_mode = #tpu.pipeline_mode<synchronous>, transform_indices = @transform_3, window_bounds = array<i64: 9, 128, 128>}, {pipeline_mode = #tpu.pipeline_mode<synchronous>, transform_indices = @transform_4, window_bounds = array<i64: 1, 128>}, {transform_indices = @transform_5, window_bounds = array<i64: 1, 8, 16, 128>}]} {
    %c0 = arith.constant 0 : index
    %c0_0 = arith.constant 0 : index
    %c0_1 = arith.constant 0 : index
    %0 = vector.load %arg2[%c0, %c0_0, %c0_1] : memref<1x160x36xbf16, #tpu.memory_space<vmem>>, vector<1x160x36xbf16>
    %1 = vector.shape_cast %0 : vector<1x160x36xbf16> to vector<160x36xbf16>
    %c0_2 = arith.constant 0 : index
    %c0_3 = arith.constant 0 : index
    %2 = vector.load %arg3[%c0_2, %c0_3] : memref<36x128xbf16, #tpu.memory_space<vmem>>, vector<36x128xbf16>
    %cst = arith.constant dense<0.000000e+00> : vector<160x128xf32>
    %3 = tpu.matmul %1, %2, %cst {dimension_numbers = #tpu.dot_dimension_numbers<[1], [0], [0], [1], [0, 0, 1, 1], [], []>} : vector<160x36xbf16>, vector<36x128xbf16>, vector<160x128xf32> -> vector<160x128xf32>
    %c0_4 = arith.constant 0 : index
    %c0_5 = arith.constant 0 : index
    %4 = vector.load %arg4[%c0_4, %c0_5] : memref<1x128xf32, #tpu.memory_space<vmem>>, vector<1x128xf32>
    %5 = vector.broadcast %4 : vector<1x128xf32> to vector<160x128xf32>
    %6 = arith.addf %3, %5 : vector<160x128xf32>
    %cst_6 = arith.constant 0.000000e+00 : f32
    %7 = vector.broadcast %cst_6 : f32 to vector<160x128xf32>
    %8 = arith.maximumf %6, %7 : vector<160x128xf32>
    %9 = arith.truncf %8 : vector<160x128xf32> to vector<160x128xbf16>
    %cst_7 = arith.constant 0.000000e+00 : bf16
    %10 = vector.broadcast %cst_7 : bf16 to vector<10x1x128xbf16>
    %c0_8 = arith.constant 0 : index
    %c0_9 = arith.constant 0 : index
    %c0_10 = arith.constant 0 : index
    %11 = vector.load %arg8[%c0_8, %c0_9, %c0_10] : memref<10x18x128xbf16, #tpu.memory_space<vmem>>, vector<10x1x128xbf16>
    tpu.vector_store %arg8[%c0_8, %c0_9, %c0_10], %10 {strides = array<i32>} : memref<10x18x128xbf16, #tpu.memory_space<vmem>>, vector<10x1x128xbf16>,
    %c0_11 = arith.constant 0 : index
    %c17 = arith.constant 17 : index
    %c0_12 = arith.constant 0 : index
    %12 = vector.load %arg8[%c0_11, %c17, %c0_12] : memref<10x18x128xbf16, #tpu.memory_space<vmem>>, vector<10x1x128xbf16>
    tpu.vector_store %arg8[%c0_11, %c17, %c0_12], %10 {strides = array<i32>} : memref<10x18x128xbf16, #tpu.memory_space<vmem>>, vector<10x1x128xbf16>,
    %13 = vector.shape_cast %9 : vector<160x128xbf16> to vector<10x16x128xbf16>
    %c0_13 = arith.constant 0 : index
    %c1 = arith.constant 1 : index
    %c0_14 = arith.constant 0 : index
    %14 = vector.load %arg8[%c0_13, %c1, %c0_14] : memref<10x18x128xbf16, #tpu.memory_space<vmem>>, vector<10x16x128xbf16>
    tpu.vector_store %arg8[%c0_13, %c1, %c0_14], %13 {strides = array<i32>} : memref<10x18x128xbf16, #tpu.memory_space<vmem>>, vector<10x16x128xbf16>,
    %cst_15 = arith.constant 0.000000e+00 : bf16
    %15 = vector.broadcast %cst_15 : bf16 to vector<1x16x128xbf16>
    %c0_i32 = arith.constant 0 : i32
    %16 = arith.cmpi eq, %arg1, %c0_i32 : i32
    %17 = arith.extui %16 : i1 to i32
    %c0_i32_16 = arith.constant 0 : i32
    %18 = arith.cmpi ne, %17, %c0_i32_16 : i32
    scf.if %18 {
      %c0_82 = arith.constant 0 : index
      %c1_83 = arith.constant 1 : index
      %c0_84 = arith.constant 0 : index
      %87 = vector.load %arg8[%c0_82, %c1_83, %c0_84] : memref<10x18x128xbf16, #tpu.memory_space<vmem>>, vector<1x16x128xbf16>
      tpu.vector_store %arg8[%c0_82, %c1_83, %c0_84], %15 {strides = array<i32>} : memref<10x18x128xbf16, #tpu.memory_space<vmem>>, vector<1x16x128xbf16>,
    } else {
    }
    %c1_i32 = arith.constant 1 : i32
    %19 = arith.cmpi eq, %arg1, %c1_i32 : i32
    %20 = arith.extui %19 : i1 to i32
    %c0_i32_17 = arith.constant 0 : i32
    %21 = arith.cmpi ne, %20, %c0_i32_17 : i32
    scf.if %21 {
      %c9 = arith.constant 9 : index
      %c1_82 = arith.constant 1 : index
      %c0_83 = arith.constant 0 : index
      %87 = vector.load %arg8[%c9, %c1_82, %c0_83] : memref<10x18x128xbf16, #tpu.memory_space<vmem>>, vector<1x16x128xbf16>
      tpu.vector_store %arg8[%c9, %c1_82, %c0_83], %15 {strides = array<i32>} : memref<10x18x128xbf16, #tpu.memory_space<vmem>>, vector<1x16x128xbf16>,
    } else {
    }
    %cst_18 = arith.constant 0.000000e+00 : f32
    %22 = vector.broadcast %cst_18 : f32 to vector<128x128xf32>
    %c0_19 = arith.constant 0 : index
    %c0_20 = arith.constant 0 : index
    %c0_21 = arith.constant 0 : index
    %23 = vector.load %arg8[%c0_19, %c0_20, %c0_21] : memref<10x18x128xbf16, #tpu.memory_space<vmem>>, vector<8x16x128xbf16>
    %24 = vector.shape_cast %23 : vector<8x16x128xbf16> to vector<128x128xbf16>
    %c0_22 = arith.constant 0 : index
    %c0_23 = arith.constant 0 : index
    %c0_24 = arith.constant 0 : index
    %25 = vector.load %arg5[%c0_22, %c0_23, %c0_24] : memref<9x128x128xbf16, #tpu.memory_space<vmem>>, vector<1x128x128xbf16>
    %26 = vector.shape_cast %25 : vector<1x128x128xbf16> to vector<128x128xbf16>
    %cst_25 = arith.constant dense<0.000000e+00> : vector<128x128xf32>
    %27 = tpu.matmul %24, %26, %cst_25 {dimension_numbers = #tpu.dot_dimension_numbers<[1], [0], [0], [1], [0, 0, 1, 1], [], []>} : vector<128x128xbf16>, vector<128x128xbf16>, vector<128x128xf32> -> vector<128x128xf32>
    %28 = arith.addf %22, %27 : vector<128x128xf32>
    %c0_26 = arith.constant 0 : index
    %c1_27 = arith.constant 1 : index
    %c0_28 = arith.constant 0 : index
    %29 = vector.load %arg8[%c0_26, %c1_27, %c0_28] : memref<10x18x128xbf16, #tpu.memory_space<vmem>>, vector<8x16x128xbf16>
    %30 = vector.shape_cast %29 : vector<8x16x128xbf16> to vector<128x128xbf16>
    %c1_29 = arith.constant 1 : index
    %c0_30 = arith.constant 0 : index
    %c0_31 = arith.constant 0 : index
    %31 = vector.load %arg5[%c1_29, %c0_30, %c0_31] : memref<9x128x128xbf16, #tpu.memory_space<vmem>>, vector<1x128x128xbf16>
    %32 = vector.shape_cast %31 : vector<1x128x128xbf16> to vector<128x128xbf16>
    %cst_32 = arith.constant dense<0.000000e+00> : vector<128x128xf32>
    %33 = tpu.matmul %30, %32, %cst_32 {dimension_numbers = #tpu.dot_dimension_numbers<[1], [0], [0], [1], [0, 0, 1, 1], [], []>} : vector<128x128xbf16>, vector<128x128xbf16>, vector<128x128xf32> -> vector<128x128xf32>
    %34 = arith.addf %28, %33 : vector<128x128xf32>
    %c0_33 = arith.constant 0 : index
    %c2 = arith.constant 2 : index
    %c0_34 = arith.constant 0 : index
    %35 = vector.load %arg8[%c0_33, %c2, %c0_34] : memref<10x18x128xbf16, #tpu.memory_space<vmem>>, vector<8x16x128xbf16>
    %36 = vector.shape_cast %35 : vector<8x16x128xbf16> to vector<128x128xbf16>
    %c2_35 = arith.constant 2 : index
    %c0_36 = arith.constant 0 : index
    %c0_37 = arith.constant 0 : index
    %37 = vector.load %arg5[%c2_35, %c0_36, %c0_37] : memref<9x128x128xbf16, #tpu.memory_space<vmem>>, vector<1x128x128xbf16>
    %38 = vector.shape_cast %37 : vector<1x128x128xbf16> to vector<128x128xbf16>
    %cst_38 = arith.constant dense<0.000000e+00> : vector<128x128xf32>
    %39 = tpu.matmul %36, %38, %cst_38 {dimension_numbers = #tpu.dot_dimension_numbers<[1], [0], [0], [1], [0, 0, 1, 1], [], []>} : vector<128x128xbf16>, vector<128x128xbf16>, vector<128x128xf32> -> vector<128x128xf32>
    %40 = arith.addf %34, %39 : vector<128x128xf32>
    %c1_39 = arith.constant 1 : index
    %c0_40 = arith.constant 0 : index
    %c0_41 = arith.constant 0 : index
    %41 = vector.load %arg8[%c1_39, %c0_40, %c0_41] : memref<10x18x128xbf16, #tpu.memory_space<vmem>>, vector<8x16x128xbf16>
    %42 = vector.shape_cast %41 : vector<8x16x128xbf16> to vector<128x128xbf16>
    %c3 = arith.constant 3 : index
    %c0_42 = arith.constant 0 : index
    %c0_43 = arith.constant 0 : index
    %43 = vector.load %arg5[%c3, %c0_42, %c0_43] : memref<9x128x128xbf16, #tpu.memory_space<vmem>>, vector<1x128x128xbf16>
    %44 = vector.shape_cast %43 : vector<1x128x128xbf16> to vector<128x128xbf16>
    %cst_44 = arith.constant dense<0.000000e+00> : vector<128x128xf32>
    %45 = tpu.matmul %42, %44, %cst_44 {dimension_numbers = #tpu.dot_dimension_numbers<[1], [0], [0], [1], [0, 0, 1, 1], [], []>} : vector<128x128xbf16>, vector<128x128xbf16>, vector<128x128xf32> -> vector<128x128xf32>
    %46 = arith.addf %40, %45 : vector<128x128xf32>
    %c1_45 = arith.constant 1 : index
    %c1_46 = arith.constant 1 : index
    %c0_47 = arith.constant 0 : index
    %47 = vector.load %arg8[%c1_45, %c1_46, %c0_47] : memref<10x18x128xbf16, #tpu.memory_space<vmem>>, vector<8x16x128xbf16>
    %48 = vector.shape_cast %47 : vector<8x16x128xbf16> to vector<128x128xbf16>
    %c4 = arith.constant 4 : index
    %c0_48 = arith.constant 0 : index
    %c0_49 = arith.constant 0 : index
    %49 = vector.load %arg5[%c4, %c0_48, %c0_49] : memref<9x128x128xbf16, #tpu.memory_space<vmem>>, vector<1x128x128xbf16>
    %50 = vector.shape_cast %49 : vector<1x128x128xbf16> to vector<128x128xbf16>
    %cst_50 = arith.constant dense<0.000000e+00> : vector<128x128xf32>
    %51 = tpu.matmul %48, %50, %cst_50 {dimension_numbers = #tpu.dot_dimension_numbers<[1], [0], [0], [1], [0, 0, 1, 1], [], []>} : vector<128x128xbf16>, vector<128x128xbf16>, vector<128x128xf32> -> vector<128x128xf32>
    %52 = arith.addf %46, %51 : vector<128x128xf32>
    %c1_51 = arith.constant 1 : index
    %c2_52 = arith.constant 2 : index
    %c0_53 = arith.constant 0 : index
    %53 = vector.load %arg8[%c1_51, %c2_52, %c0_53] : memref<10x18x128xbf16, #tpu.memory_space<vmem>>, vector<8x16x128xbf16>
    %54 = vector.shape_cast %53 : vector<8x16x128xbf16> to vector<128x128xbf16>
    %c5 = arith.constant 5 : index
    %c0_54 = arith.constant 0 : index
    %c0_55 = arith.constant 0 : index
    %55 = vector.load %arg5[%c5, %c0_54, %c0_55] : memref<9x128x128xbf16, #tpu.memory_space<vmem>>, vector<1x128x128xbf16>
    %56 = vector.shape_cast %55 : vector<1x128x128xbf16> to vector<128x128xbf16>
    %cst_56 = arith.constant dense<0.000000e+00> : vector<128x128xf32>
    %57 = tpu.matmul %54, %56, %cst_56 {dimension_numbers = #tpu.dot_dimension_numbers<[1], [0], [0], [1], [0, 0, 1, 1], [], []>} : vector<128x128xbf16>, vector<128x128xbf16>, vector<128x128xf32> -> vector<128x128xf32>
    %58 = arith.addf %52, %57 : vector<128x128xf32>
    %c2_57 = arith.constant 2 : index
    %c0_58 = arith.constant 0 : index
    %c0_59 = arith.constant 0 : index
    %59 = vector.load %arg8[%c2_57, %c0_58, %c0_59] : memref<10x18x128xbf16, #tpu.memory_space<vmem>>, vector<8x16x128xbf16>
    %60 = vector.shape_cast %59 : vector<8x16x128xbf16> to vector<128x128xbf16>
    %c6 = arith.constant 6 : index
    %c0_60 = arith.constant 0 : index
    %c0_61 = arith.constant 0 : index
    %61 = vector.load %arg5[%c6, %c0_60, %c0_61] : memref<9x128x128xbf16, #tpu.memory_space<vmem>>, vector<1x128x128xbf16>
    %62 = vector.shape_cast %61 : vector<1x128x128xbf16> to vector<128x128xbf16>
    %cst_62 = arith.constant dense<0.000000e+00> : vector<128x128xf32>
    %63 = tpu.matmul %60, %62, %cst_62 {dimension_numbers = #tpu.dot_dimension_numbers<[1], [0], [0], [1], [0, 0, 1, 1], [], []>} : vector<128x128xbf16>, vector<128x128xbf16>, vector<128x128xf32> -> vector<128x128xf32>
    %64 = arith.addf %58, %63 : vector<128x128xf32>
    %c2_63 = arith.constant 2 : index
    %c1_64 = arith.constant 1 : index
    %c0_65 = arith.constant 0 : index
    %65 = vector.load %arg8[%c2_63, %c1_64, %c0_65] : memref<10x18x128xbf16, #tpu.memory_space<vmem>>, vector<8x16x128xbf16>
    %66 = vector.shape_cast %65 : vector<8x16x128xbf16> to vector<128x128xbf16>
    %c7 = arith.constant 7 : index
    %c0_66 = arith.constant 0 : index
    %c0_67 = arith.constant 0 : index
    %67 = vector.load %arg5[%c7, %c0_66, %c0_67] : memref<9x128x128xbf16, #tpu.memory_space<vmem>>, vector<1x128x128xbf16>
    %68 = vector.shape_cast %67 : vector<1x128x128xbf16> to vector<128x128xbf16>
    %cst_68 = arith.constant dense<0.000000e+00> : vector<128x128xf32>
    %69 = tpu.matmul %66, %68, %cst_68 {dimension_numbers = #tpu.dot_dimension_numbers<[1], [0], [0], [1], [0, 0, 1, 1], [], []>} : vector<128x128xbf16>, vector<128x128xbf16>, vector<128x128xf32> -> vector<128x128xf32>
    %70 = arith.addf %64, %69 : vector<128x128xf32>
    %c2_69 = arith.constant 2 : index
    %c2_70 = arith.constant 2 : index
    %c0_71 = arith.constant 0 : index
    %71 = vector.load %arg8[%c2_69, %c2_70, %c0_71] : memref<10x18x128xbf16, #tpu.memory_space<vmem>>, vector<8x16x128xbf16>
    %72 = vector.shape_cast %71 : vector<8x16x128xbf16> to vector<128x128xbf16>
    %c8 = arith.constant 8 : index
    %c0_72 = arith.constant 0 : index
    %c0_73 = arith.constant 0 : index
    %73 = vector.load %arg5[%c8, %c0_72, %c0_73] : memref<9x128x128xbf16, #tpu.memory_space<vmem>>, vector<1x128x128xbf16>
    %74 = vector.shape_cast %73 : vector<1x128x128xbf16> to vector<128x128xbf16>
    %cst_74 = arith.constant dense<0.000000e+00> : vector<128x128xf32>
    %75 = tpu.matmul %72, %74, %cst_74 {dimension_numbers = #tpu.dot_dimension_numbers<[1], [0], [0], [1], [0, 0, 1, 1], [], []>} : vector<128x128xbf16>, vector<128x128xbf16>, vector<128x128xf32> -> vector<128x128xf32>
    %76 = arith.addf %70, %75 : vector<128x128xf32>
    %c0_75 = arith.constant 0 : index
    %c0_76 = arith.constant 0 : index
    %77 = vector.load %arg6[%c0_75, %c0_76] : memref<1x128xf32, #tpu.memory_space<vmem>>, vector<1x128xf32>
    %78 = vector.broadcast %77 : vector<1x128xf32> to vector<128x128xf32>
    %79 = arith.addf %76, %78 : vector<128x128xf32>
    %cst_77 = arith.constant 0.000000e+00 : f32
    %80 = vector.broadcast %cst_77 : f32 to vector<128x128xf32>
    %81 = arith.maximumf %79, %80 : vector<128x128xf32>
    %82 = vector.shape_cast %81 : vector<128x128xf32> to vector<8x16x128xf32>
    %83 = arith.truncf %82 : vector<8x16x128xf32> to vector<8x16x128xbf16>
    %c0_78 = arith.constant 0 : index
    %c0_79 = arith.constant 0 : index
    %c0_80 = arith.constant 0 : index
    %c0_81 = arith.constant 0 : index
    %84 = vector.load %arg7[%c0_78, %c0_79, %c0_80, %c0_81] : memref<1x8x16x128xbf16, #tpu.memory_space<vmem>>, vector<1x8x16x128xbf16>
    %85 = vector.shape_cast %84 : vector<1x8x16x128xbf16> to vector<8x16x128xbf16>
    %86 = vector.shape_cast %83 : vector<8x16x128xbf16> to vector<1x8x16x128xbf16>
    tpu.vector_store %arg7[%c0_78, %c0_79, %c0_80, %c0_81], %86 {strides = array<i32>} : memref<1x8x16x128xbf16, #tpu.memory_space<vmem>>, vector<1x8x16x128xbf16>,
    return
  }
  func.func @transform_0(%arg0: i32, %arg1: i32) -> (i32, i32, i32) {
    %c2_i32 = arith.constant 2 : i32
    %0 = arith.muli %arg0, %c2_i32 : i32
    %1 = arith.addi %0, %arg1 : i32
    %c0_i32 = arith.constant 0 : i32
    %c0_i32_0 = arith.constant 0 : i32
    %c0_i32_1 = arith.constant 0 : i32
    return %1, %c0_i32, %c0_i32_0 : i32, i32, i32
  }
  func.func @transform_1(%arg0: i32, %arg1: i32) -> (i32, i32) {
    %c0_i32 = arith.constant 0 : i32
    %c0_i32_0 = arith.constant 0 : i32
    %c0_i32_1 = arith.constant 0 : i32
    return %c0_i32, %c0_i32_0 : i32, i32
  }
  func.func @transform_2(%arg0: i32, %arg1: i32) -> (i32, i32) {
    %c0_i32 = arith.constant 0 : i32
    %c0_i32_0 = arith.constant 0 : i32
    %c0_i32_1 = arith.constant 0 : i32
    return %c0_i32, %c0_i32_0 : i32, i32
  }
  func.func @transform_3(%arg0: i32, %arg1: i32) -> (i32, i32, i32) {
    %c0_i32 = arith.constant 0 : i32
    %c0_i32_0 = arith.constant 0 : i32
    %c0_i32_1 = arith.constant 0 : i32
    %c0_i32_2 = arith.constant 0 : i32
    return %c0_i32, %c0_i32_0, %c0_i32_1 : i32, i32, i32
  }
  func.func @transform_4(%arg0: i32, %arg1: i32) -> (i32, i32) {
    %c0_i32 = arith.constant 0 : i32
    %c0_i32_0 = arith.constant 0 : i32
    %c0_i32_1 = arith.constant 0 : i32
    return %c0_i32, %c0_i32_0 : i32, i32
  }
  func.func @transform_5(%arg0: i32, %arg1: i32) -> (i32, i32, i32, i32) {
    %c0_i32 = arith.constant 0 : i32
    %c0_i32_0 = arith.constant 0 : i32
    %c0_i32_1 = arith.constant 0 : i32
    return %arg0, %arg1, %c0_i32, %c0_i32_0 : i32, i32, i32, i32
  }
}

</mosaic_0001>

<bundles_post_ra>
// kernel: double_conv_forward.1
= control target key start
LH: loop header
LB: loop body
LE: loop exit
PB: predicated region body
PF: predicated region fallthrough
CT: control target
= control target key end

     0   :  { %s5295_s18 = smov 0   ;;  %s5297_s19 = smov 0   ;;  %s6413_s0 = inlined_call_operand.vmem [shape: bf16[4,160,36], index: 0, kind: input, shape index: {}]   ;;  %s6414_s1 = inlined_call_operand.vmem [shape: bf16[36,128], index: 1, kind: input, shape index: {}]   ;;  %s6415_s2 = inlined_call_operand.vmem [shape: f32[1,128], index: 2, kind: input, shape index: {}]   ;;  %s6416_s3 = inlined_call_operand.vmem [shape: bf16[9,128,128], index: 3, kind: input, shape index: {}]   ;;  %s6417_s4 = inlined_call_operand.vmem [shape: f32[1,128], index: 4, kind: input, shape index: {}]   ;;  %s6418_s5 = inlined_call_operand.vmem [shape: bf16[2,16,16,128], index: 5, kind: output, shape index: {}]  }
   0x1   :  { %s5299_s20 = smov 0   ;;  %s5301_s21 = smov 0  }
   0x2   :  { %s5303_s22 = smov 0  }
   0x3 LB: > { %s24_s23 = sadd.s32 1, %s5253_s20  ;;  %s27_s24 = sadd.s32 1, %s5257_s21  ;;  %s5261_s22 = sphi %s5303_s22, %s15_s22   ;;  %s5257_s21 = sphi %s5301_s21, %s6443_s21   ;;  %s5253_s20 = sphi %s5299_s20, %s6442_s20   ;;  %s5249_s19 = sphi %s5297_s19, %s6441_s19   ;;  %s5245_s18 = sphi %s5295_s18, %s6440_s18  }
   0x4   : > { %p25_p0 = scmp.ge.s32.totalorder %s24_s23, 2  ;;  %p4016_p1 = scmp.ge.s32.totalorder %s5261_s22, 1 }
   0x5   : > { %p209_p2 = scmp.lt.s32.totalorder %s5261_s22, 5 }
   0x6   : > { %s6445_s23 = smov (%p25_p0, %s24_s23), 0  ;;  %s6447_s24 = smov (!%p25_p0, %s27_s24), %s5257_s21 }
   0x7   : > { %p210_p3 = pnand %p4016_p1, %p209_p2  ;;  %p29_p4 = scmp.ge.s32.totalorder %s6447_s24, 2 }
   0x9   : > { %s6449_s24 = smov (%p29_p4, %s6447_s24), 0  ;;  %213 = sbr.rel (%p210_p3) target bundleno = 745 (0x2e9), region = 40 }
  0x10   : > { %s4019_s25 = sshll.u32 %s5245_s18, 3  ;;  %p254_p5 = scmp.lt.s32.totalorder %s5249_s19, 1  ;;  %v5110_v0 = vld [vmem:[%s6414_s1] sm:$0xff]   ;;  %v5111_v1 = vld [vmem:[%s6414_s1 + $0x8] sm:$0xff]   ;;  %vm393_vm0 = vcmask 1041408   ;;  %vm362_vm1 = vcmask 293888  }
  0x11   : > { %p256_p6 = scmp.lt.s32.totalorder %s4019_s25, 15  ;;  %4624 = vmatprep.subr.bf16.mxu0 %v5110_v0  ;;  %s4017_s7 = sshll.u32 %s5249_s19, 1  ;;  %v5112_v2 = vld [vmem:[%s6414_s1 + $0x10] ss:$0 sps:$4 sm:$0x33]   ;;  %vm540_vm2 = vcmask 1040384  }
  0x12   : > { %s255_s28 = scalar_select %p254_p5, %s5249_s19, 1  ;;  %4625 = vmatpush3.bf16.msra.mxu0 %v5110_v0  ;;  %v395_v3 = vsel %vm393_vm0, %v5112_v2, 0  ;;  %vm541_vm3 = vsmask.f32 256  ;;  %v546_v15 = vld [vmem:[#allocation2 + $0xc] sm:$0x1] }
  0x13   : > { %s6451_s25 = smov (!%p256_p6, %s4019_s25), 15  ;;  %4626 = vmatprep.subr.bf16.mxu0 %v5111_v1  ;;  %s245_s11 = sadd.s32 %s5245_s18, %s4017_s7  ;;  %vm5362_vm4 = vmand %vm540_vm2, %vm541_vm3  ;;  %vm573_vm5 = vsmask.f32 7938  ;;  %v543_v18 = vld [vmem:[#allocation2] sm:$0x1]  ;;  %vm857_vm7 = vcmask 1043456  }
  0x14   : > { %s4021_s6 = sshll.u32 %s255_s28, 5  ;;  %s4020_s8 = sshll.u32 %s6451_s25, 1  ;;  %v547_v16 = vsel %vm5362_vm4, 0, %v546_v15  ;;  %vm5369_vm6 = vmand %vm540_vm2, %vm573_vm5  ;;  %v544_v19 = vsel %vm5362_vm4, 0, %v543_v18  ;;  %v578_v20 = vld [vmem:[#allocation2 + $0x14] sm:$0x1] }
  0x15   : > { %s260_s12 = sadd.s32 %s4021_s6, %s4020_s8  ;;  %p246_p7 = scmp.lt.s32.totalorder %s245_s11, 3  ;;  %548 = vst [vmem:[#allocation2 + $0xc] sm:$0x1] %v547_v16  ;;  %545 = vst [vmem:[#allocation2] sm:$0x1] %v544_v19  ;;  %v579_v21 = vsel %vm5369_vm6, 0, %v578_v20 }
  0x16   : > { %s4022_s13 = sshll.u32 %s260_s12, 2  ;;  %4627 = vmatpush3.bf16.msra.mxu0 %v5111_v1  ;;  %v575_v22 = vld [vmem:[#allocation2 + $0x8] sm:$0x1]  ;;  %580 = vst [vmem:[#allocation2 + $0x14] sm:$0x1] %v579_v21  ;;  %vm5422_vm9 = vmand %vm857_vm7, %vm573_vm5  ;;  %p4067_p8 = scmp.ne.s32.totalorder %s5245_s18, 0 }
  0x17   : > { %s5346_s16 = scalar_lea.vmem %s6418_s5, %s4022_s13  ;;  %5066 = vmatprep.subr.msk.bf16.mxu0 %vm393_vm0, %v5112_v2  ;;  %s6453_s11 = smov (!%p246_p7, %s245_s11), 3  ;;  %v576_v23 = vsel %vm5369_vm6, 0, %v575_v22  ;;  %v552_v24 = vld [vmem:[#allocation2 + $0x24] sm:$0x1]  ;;  %v549_v26 = vld [vmem:[#allocation2 + $0x18] sm:$0x1] }
  0x18   : > { %s5067_s17 = smul.u32 80, %s6453_s11  ;;  %577 = vst [vmem:[#allocation2 + $0x8] sm:$0x1] %v576_v23  ;;  %v553_v25 = vsel %vm5362_vm4, 0, %v552_v24  ;;  %v550_v27 = vsel %vm5362_vm4, 0, %v549_v26 }
  0x19   : > { %554 = vst [vmem:[#allocation2 + $0x24] sm:$0x1] %v553_v25  ;;  %551 = vst [vmem:[#allocation2 + $0x18] sm:$0x1] %v550_v27  ;;  %v584_v28 = vld [vmem:[#allocation2 + $0x2c] sm:$0x1] }
  0x1a   : > { %4629 = vmatpush3.bf16.msra.mxu0 %v395_v3  ;;  %s250_s26 = scalar_lea.vmem %s6413_s0, %s5067_s17  ;;  %v585_v29 = vsel %vm5369_vm6, 0, %v584_v28  ;;  %v581_v30 = vld [vmem:[#allocation2 + $0x20] sm:$0x1]  ;;  %v558_v32 = vld [vmem:[#allocation2 + $0x3c] sm:$0x1] }
  0x1b   : > { %v5113_v4 = vld [vmem:[%s250_s26] sm:$0xff]   ;;  %v5114_v5 = vld [vmem:[%s250_s26 + $0x8] sm:$0xff]   ;;  %v5115_v6 = vld [vmem:[%s250_s26 + $0x10] sm:$0xff]   ;;  %586 = vst [vmem:[#allocation2 + $0x2c] sm:$0x1] %v585_v29  ;;  %v582_v31 = vsel %vm5369_vm6, 0, %v581_v30 }
  0x1c   : > { %4630 = vmatprep.mubr.msk.bf16.mxu0 %vm362_vm1, %v5113_v4  ;;  %v5116_v7 = vld [vmem:[%s250_s26 + $0x18] sm:$0xff]   ;;  %v5117_v8 = vld [vmem:[%s250_s26 + $0x20] sm:$0xff]   ;;  %v5118_v9 = vld [vmem:[%s250_s26 + $0x28] sm:$0xff]   ;;  %583 = vst [vmem:[#allocation2 + $0x20] sm:$0x1] %v582_v31  ;;  %v559_v33 = vsel %vm5362_vm4, 0, %v558_v32 }
  0x1d   : > { %4631 = vmatmul.mubr.msk.bf16.vlgmr.msra.gmra.mrb[0].mxu0 %vm362_vm1, %v5114_v5  ;;  %v5119_v10 = vld [vmem:[%s250_s26 + $0x30] sm:$0xff]   ;;  %v5120_v11 = vld [vmem:[%s250_s26 + $0x38] sm:$0xff]   ;;  %v5121_v12 = vld [vmem:[%s250_s26 + $0x40] sm:$0xff]   ;;  %560 = vst [vmem:[#allocation2 + $0x3c] sm:$0x1] %v559_v33 }
  0x1e   : > { %4634 = vmatprep.mubr.msk.bf16.mxu0 %vm362_vm1, %v5115_v6  ;;  %v5122_v13 = vld [vmem:[%s250_s26 + $0x48] sm:$0xff]   ;;  %v555_v34 = vld [vmem:[#allocation2 + $0x30] sm:$0x1]  ;;  %v590_v36 = vld [vmem:[#allocation2 + $0x44] sm:$0x1] }
  0x1f   : > { %v556_v35 = vsel %vm5362_vm4, 0, %v555_v34  ;;  %v591_v37 = vsel %vm5369_vm6, 0, %v590_v36  ;;  %v587_v38 = vld [vmem:[#allocation2 + $0x38] sm:$0x1]  ;;  %v564_v40 = vld [vmem:[#allocation2 + $0x54] sm:$0x1] }
  0x20   : > { %557 = vst [vmem:[#allocation2 + $0x30] sm:$0x1] %v556_v35  ;;  %592 = vst [vmem:[#allocation2 + $0x44] sm:$0x1] %v591_v37  ;;  %v588_v39 = vsel %vm5369_vm6, 0, %v587_v38  ;;  %v565_v41 = vsel %vm5362_vm4, 0, %v564_v40 }
  0x21   : > { %589 = vst [vmem:[#allocation2 + $0x38] sm:$0x1] %v588_v39  ;;  %v561_v42 = vld [vmem:[#allocation2 + $0x48] sm:$0x1]  ;;  %566 = vst [vmem:[#allocation2 + $0x54] sm:$0x1] %v565_v41 }
  0x22   : > { %v562_v43 = vsel %vm5362_vm4, 0, %v561_v42  ;;  %v596_v44 = vld [vmem:[#allocation2 + $0x5c] sm:$0x1]  ;;  %v593_v46 = vld [vmem:[#allocation2 + $0x50] sm:$0x1] }
  0x23   : > { %563 = vst [vmem:[#allocation2 + $0x48] sm:$0x1] %v562_v43  ;;  %v597_v45 = vsel %vm5369_vm6, 0, %v596_v44  ;;  %v594_v47 = vsel %vm5369_vm6, 0, %v593_v46  ;;  %v570_v48 = vld [vmem:[#allocation2 + $0x6c] sm:$0x1] }
  0x24   : > { %598 = vst [vmem:[#allocation2 + $0x5c] sm:$0x1] %v597_v45  ;;  %595 = vst [vmem:[#allocation2 + $0x50] sm:$0x1] %v594_v47  ;;  %v571_v49 = vsel %vm5362_vm4, 0, %v570_v48 }
  0x25   : > { %4635 = vmatmul.mubr.msk.bf16.gmra.mrb[4].mxu0 %vm362_vm1, %v5116_v7  ;;  %v567_v50 = vld [vmem:[#allocation2 + $0x60] sm:$0x1]  ;;  %572 = vst [vmem:[#allocation2 + $0x6c] sm:$0x1] %v571_v49  ;;  %v602_v52 = vld [vmem:[#allocation2 + $0x74] sm:$0x1] }
  0x26   : > { %4638 = vmatprep.mubr.msk.bf16.mxu0 %vm362_vm1, %v5117_v8  ;;  %v568_v51 = vsel %vm5362_vm4, 0, %v567_v50  ;;  %v603_v53 = vsel %vm5369_vm6, 0, %v602_v52  ;;  %v599_v54 = vld [vmem:[#allocation2 + $0x68] sm:$0x1]  ;;  %v5414_v56 = vld [vmem:[%s6415_s2] ss:$0 sm:$0xff] }
  0x27   : > { %569 = vst [vmem:[#allocation2 + $0x60] sm:$0x1] %v568_v51  ;;  %604 = vst [vmem:[#allocation2 + $0x74] sm:$0x1] %v603_v53  ;;  %v600_v55 = vsel %vm5369_vm6, 0, %v599_v54 }
  0x28   : > { %601 = vst [vmem:[#allocation2 + $0x68] sm:$0x1] %v600_v55  ;;  %vm655_vm8 = vsmask.f32 4368  ;;  %v866_v21 = vld [vmem:[#allocation2 + $0xc] sm:$0xf] }
  0x29   : > { %v859_v29 = vld [vmem:[#allocation2] sm:$0xf]  ;;  %vm5429_vm10 = vmor %vm541_vm3, %vm655_vm8  ;;  %v870_v36 = vld [vmem:[#allocation2 + $0x14] sm:$0x1] }
  0x2a   : > { %v863_v42 = vld [vmem:[#allocation2 + $0x8] sm:$0x1] }
  0x2d   : > { %4639 = vmatmul.mubr.msk.bf16.gmra.mrb[8].mxu0 %vm362_vm1, %v5118_v9 }
  0x2e   : > { %4642 = vmatprep.mubr.msk.bf16.mxu0 %vm362_vm1, %v5119_v10 }
  0x35   : > { %4643 = vmatmul.mubr.msk.bf16.gmra.mrb[12].mxu0 %vm362_vm1, %v5120_v11 }
  0x36   : > { %4646 = vmatprep.mubr.msk.bf16.mxu0 %vm362_vm1, %v5121_v12 }
  0x3d   : > { %4647 = vmatmul.mubr.msk.bf16.gmra.mrb[16].mxu0 %vm362_vm1, %v5122_v13 }
  0xf0   : > { %v4632_v57 = vpop.f32.mrb[0].mxu0 }
  0xf1   : > { %v440_v58 = vadd.f32 %v4632_v57, %v5414_v56  ;;  %v431_v59 = vpop.f32.mrb[1].mxu0 }
  0xf2   : > { %v432_v60 = vadd.f32 %v5414_v56, %v431_v59  ;;  %v4633_v61 = vpop.f32.mrb[2].mxu0 }
  0xf3   : > { %v512_v62 = vmax.f32 %v440_v58, 0.0  ;;  %v443_v63 = vadd.f32 %v4633_v61, %v5414_v56  ;;  %v434_v0 = vpop.f32.mrb[3].mxu0 }
  0xf4   : > { %v510_v1 = vmax.f32 %v432_v60, 0.0  ;;  %v435_v2 = vadd.f32 %v5414_v56, %v434_v0 }
  0xf5   : > { %v4386_v3 = vpack.c.bf16 %v512_v62, %v512_v62  ;;  %v513_v4 = vmax.f32 %v443_v63, 0.0  ;;  %v880_v62 = vld [vmem:[#allocation2 + $0x24] sm:$0xf] }
  0xf6   : > { %v4384_v5 = vpack.c.bf16 %v510_v1, %v510_v1  ;;  %v511_v6 = vmax.f32 %v435_v2, 0.0 }
  0xf7   : > { %v675_v7 = vshrl.u32 %v4386_v3, 16  ;;  %v4387_v8 = vpack.c.bf16 %v513_v4, %v513_v4  ;;  %v678_v9 = vshll.u32 %v4386_v3, 16 }
  0xf8   : > { %v658_v10 = vshrl.u32 %v4384_v5, 16  ;;  %v661_v11 = vshll.u32 %v4384_v5, 16  ;;  %v4385_v12 = vpack.c.bf16 %v511_v6, %v511_v6  ;;  %v4636_v13 = vpop.f32.mrb[4].mxu0  ;;  %v873_v5 = vld [vmem:[#allocation2 + $0x18] sm:$0xf] }
  0xf9   : > { %v677_v15 = vrot.slane %v675_v7, 7  ;;  %v683_v16 = vshrl.u32 %v4387_v8, 16  ;;  %v686_v17 = vshll.u32 %v4387_v8, 16  ;;  %v456_v18 = vadd.f32 %v4636_v13, %v5414_v56  ;;  %v447_v19 = vpop.f32.mrb[5].mxu0 }
  0xfa   : > { %v660_v22 = vrot.slane %v658_v10, 7  ;;  %v666_v23 = vshrl.u32 %v4385_v12, 16  ;;  %v669_v24 = vshll.u32 %v4385_v12, 16  ;;  %v448_v25 = vadd.f32 %v5414_v56, %v447_v19  ;;  %v4637_v26 = vpop.f32.mrb[6].mxu0 }
  0xfb   : > { %v680_v27 = vor.u32 %v678_v9, %v677_v15  ;;  %v681_v28 = vrot.slane %v677_v15, 4  ;;  %v685_v30 = vrot.slane %v683_v16, 7  ;;  %v516_v31 = vmax.f32 %v456_v18, 0.0  ;;  %v450_v32 = vpop.f32.mrb[7].mxu0 }
  0xfc   : > { %v663_v33 = vor.u32 %v661_v11, %v660_v22  ;;  %v664_v34 = vrot.slane %v660_v22, 4  ;;  %v668_v37 = vrot.slane %v666_v23, 7  ;;  %v514_v38 = vmax.f32 %v448_v25, 0.0 }
  0xfd   : > { %v867_v39 = vsel %vm5422_vm9, %v680_v27, %v866_v21  ;;  %v688_v40 = vor.u32 %v686_v17, %v685_v30  ;;  %v690_v41 = vrot.slane %v685_v30, 4  ;;  %v4390_v43 = vpack.c.bf16 %v516_v31, %v516_v31  ;;  %v884_v27 = vld [vmem:[#allocation2 + $0x2c] sm:$0x1] }
  0xfe   : > { %868 = vst [vmem:[#allocation2 + $0xc] sm:$0xf] %v867_v39  ;;  %v860_v44 = vsel %vm5422_vm9, %v663_v33, %v859_v29  ;;  %v671_v45 = vor.u32 %v669_v24, %v668_v37  ;;  %v673_v46 = vrot.slane %v668_v37, 4  ;;  %v4388_v47 = vpack.c.bf16 %v514_v38, %v514_v38 }
  0xff   : > { %861 = vst [vmem:[#allocation2] sm:$0xf] %v860_v44  ;;  %v689_v48 = vsel %vm5429_vm10, %v681_v28, %v688_v40  ;;  %v871_v49 = vsel %vm5362_vm4, %v690_v41, %v870_v36  ;;  %v709_v50 = vshrl.u32 %v4390_v43, 16  ;;  %v712_v53 = vshll.u32 %v4390_v43, 16  ;;  %v877_v28 = vld [vmem:[#allocation2 + $0x20] sm:$0x1] }
 0x100   : > { %869 = vst [vmem:[#allocation2 + $0x10] sm:$0xf] %v689_v48  ;;  %872 = vst [vmem:[#allocation2 + $0x14] sm:$0x1] %v871_v49  ;;  %v672_v51 = vsel %vm5429_vm10, %v664_v34, %v671_v45  ;;  %v864_v52 = vsel %vm5362_vm4, %v673_v46, %v863_v42  ;;  %v692_v54 = vshrl.u32 %v4388_v47, 16  ;;  %v4640_v55 = vpop.f32.mrb[8].mxu0  ;;  %v459_v58 = vadd.f32 %v4637_v26, %v5414_v56 }
 0x101   : > { %862 = vst [vmem:[#allocation2 + $0x4] sm:$0xf] %v672_v51  ;;  %865 = vst [vmem:[#allocation2 + $0x8] sm:$0x1] %v864_v52  ;;  %v5445_v57 = vrot.slane %v709_v50, 7  ;;  %v451_v59 = vadd.f32 %v5414_v56, %v450_v32  ;;  %v472_v60 = vadd.f32 %v4640_v55, %v5414_v56  ;;  %v463_v61 = vpop.f32.mrb[9].mxu0 }
 0x102   : > { %v694_v63 = vrot.slane %v692_v54, 7  ;;  %v695_v0 = vshll.u32 %v4388_v47, 16  ;;  %v464_v1 = vadd.f32 %v5414_v56, %v463_v61  ;;  %v4641_v2 = vpop.f32.mrb[10].mxu0  ;;  %v517_v6 = vmax.f32 %v459_v58, 0.0  ;;  %v894_v41 = vld [vmem:[#allocation2 + $0x3c] sm:$0xf] }
 0x103   : > { %v714_v3 = vor.u32 %v712_v53, %v5445_v57  ;;  %v715_v4 = vrot.slane %v5445_v57, 4  ;;  %v515_v7 = vmax.f32 %v451_v59, 0.0  ;;  %v466_v8 = vpop.f32.mrb[11].mxu0  ;;  %v520_v11 = vmax.f32 %v472_v60, 0.0  ;;  %v887_v50 = vld [vmem:[#allocation2 + $0x30] sm:$0xf] }
 0x104   : > { %v697_v9 = vor.u32 %v695_v0, %v694_v63  ;;  %v698_v10 = vrot.slane %v694_v63, 4  ;;  %v518_v12 = vmax.f32 %v464_v1, 0.0  ;;  %v4391_v15 = vpack.c.bf16 %v517_v6, %v517_v6 }
 0x105   : > { %v881_v13 = vsel %vm5422_vm9, %v714_v3, %v880_v62  ;;  %v4389_v16 = vpack.c.bf16 %v515_v7, %v515_v7  ;;  %v475_v17 = vadd.f32 %v4641_v2, %v5414_v56  ;;  %v4394_v19 = vpack.c.bf16 %v520_v11, %v520_v11 }
 0x106   : > { %882 = vst [vmem:[#allocation2 + $0x24] sm:$0xf] %v881_v13  ;;  %v874_v18 = vsel %vm5422_vm9, %v697_v9, %v873_v5  ;;  %v4392_v21 = vpack.c.bf16 %v518_v12, %v518_v12  ;;  %v467_v22 = vadd.f32 %v5414_v56, %v466_v8  ;;  %v717_v23 = vshrl.u32 %v4391_v15, 16 }
 0x107   : > { %875 = vst [vmem:[#allocation2 + $0x18] sm:$0xf] %v874_v18  ;;  %v720_v24 = vshll.u32 %v4391_v15, 16  ;;  %v700_v25 = vshrl.u32 %v4389_v16, 16  ;;  %v703_v26 = vshll.u32 %v4389_v16, 16  ;;  %v743_v29 = vshrl.u32 %v4394_v19, 16 }
 0x108   : > { %v746_v30 = vshll.u32 %v4394_v19, 16  ;;  %v726_v31 = vshrl.u32 %v4392_v21, 16  ;;  %v729_v32 = vshll.u32 %v4392_v21, 16  ;;  %v4644_v33 = vpop.f32.mrb[12].mxu0  ;;  %v719_v34 = vrot.slane %v717_v23, 7 }
 0x109   : > { %v702_v36 = vrot.slane %v700_v25, 7  ;;  %v521_v37 = vmax.f32 %v475_v17, 0.0  ;;  %v519_v38 = vmax.f32 %v467_v22, 0.0  ;;  %v479_v39 = vpop.f32.mrb[13].mxu0  ;;  %v5459_v40 = vrot.slane %v743_v29, 7 }
 0x10a   : > { %v5461_v42 = vrot.slane %v726_v31, 7  ;;  %v488_v43 = vadd.f32 %v4644_v33, %v5414_v56  ;;  %v480_v44 = vadd.f32 %v5414_v56, %v479_v39  ;;  %v4645_v45 = vpop.f32.mrb[14].mxu0  ;;  %v722_v46 = vor.u32 %v720_v24, %v719_v34  ;;  %v891_v19 = vld [vmem:[#allocation2 + $0x38] sm:$0x1] }
 0x10b   : > { %v724_v47 = vrot.slane %v719_v34, 4  ;;  %v705_v48 = vor.u32 %v703_v26, %v702_v36  ;;  %v707_v49 = vrot.slane %v702_v36, 4  ;;  %v482_v51 = vpop.f32.mrb[15].mxu0  ;;  %v748_v52 = vor.u32 %v746_v30, %v5459_v40 }
 0x10c   : > { %v749_v53 = vrot.slane %v5459_v40, 4  ;;  %v731_v54 = vor.u32 %v729_v32, %v5461_v42  ;;  %v732_v55 = vrot.slane %v5461_v42, 4  ;;  %v723_v57 = vsel %vm5429_vm10, %v715_v4, %v722_v46  ;;  %v908_v42 = vld [vmem:[#allocation2 + $0x54] sm:$0xf] }
 0x10d   : > { %v885_v58 = vsel %vm5362_vm4, %v724_v47, %v884_v27  ;;  %v706_v59 = vsel %vm5429_vm10, %v698_v10, %v705_v48  ;;  %v878_v60 = vsel %vm5362_vm4, %v707_v49, %v877_v28  ;;  %883 = vst [vmem:[#allocation2 + $0x28] sm:$0xf] %v723_v57  ;;  %v895_v61 = vsel %vm5422_vm9, %v748_v52, %v894_v41  ;;  %v898_v10 = vld [vmem:[#allocation2 + $0x44] sm:$0x1] }
 0x10e   : > { %886 = vst [vmem:[#allocation2 + $0x2c] sm:$0x1] %v885_v58  ;;  %876 = vst [vmem:[#allocation2 + $0x1c] sm:$0xf] %v706_v59  ;;  %v888_v62 = vsel %vm5422_vm9, %v731_v54, %v887_v50  ;;  %v4395_v63 = vpack.c.bf16 %v521_v37, %v521_v37  ;;  %v4393_v0 = vpack.c.bf16 %v519_v38, %v519_v38  ;;  %v524_v1 = vmax.f32 %v488_v43, 0.0 }
 0x10f   : > { %879 = vst [vmem:[#allocation2 + $0x20] sm:$0x1] %v878_v60  ;;  %896 = vst [vmem:[#allocation2 + $0x3c] sm:$0xf] %v895_v61  ;;  %v522_v2 = vmax.f32 %v480_v44, 0.0  ;;  %v491_v3 = vadd.f32 %v4645_v45, %v5414_v56  ;;  %v483_v4 = vadd.f32 %v5414_v56, %v482_v51 }
 0x110   : > { %889 = vst [vmem:[#allocation2 + $0x30] sm:$0xf] %v888_v62  ;;  %v751_v5 = vshrl.u32 %v4395_v63, 16  ;;  %v754_v6 = vshll.u32 %v4395_v63, 16  ;;  %v734_v7 = vshrl.u32 %v4393_v0, 16  ;;  %v737_v8 = vshll.u32 %v4393_v0, 16 }
 0x111   : > { %v4648_v9 = vpop.f32.mrb[16].mxu0  ;;  %v4398_v11 = vpack.c.bf16 %v524_v1, %v524_v1  ;;  %v4396_v12 = vpack.c.bf16 %v522_v2, %v522_v2  ;;  %v525_v13 = vmax.f32 %v491_v3, 0.0  ;;  %v523_v15 = vmax.f32 %v483_v4, 0.0  ;;  %v901_v43 = vld [vmem:[#allocation2 + $0x48] sm:$0xf] }
 0x112   : > { %v495_v16 = vpop.f32.mrb[17].mxu0  ;;  %v753_v17 = vrot.slane %v751_v5, 7  ;;  %v736_v18 = vrot.slane %v734_v7, 7  ;;  %v504_v21 = vadd.f32 %v4648_v9, %v5414_v56  ;;  %v912_v59 = vld [vmem:[#allocation2 + $0x5c] sm:$0x1] }
 0x113   : > { %v496_v22 = vadd.f32 %v5414_v56, %v495_v16  ;;  %v4649_v23 = vpop.f32.mrb[18].mxu0  ;;  %v777_v24 = vshrl.u32 %v4398_v11, 16  ;;  %v780_v25 = vshll.u32 %v4398_v11, 16  ;;  %v760_v26 = vshrl.u32 %v4396_v12, 16  ;;  %v905_v60 = vld [vmem:[#allocation2 + $0x50] sm:$0x1] }
 0x114   : > { %v763_v27 = vshll.u32 %v4396_v12, 16  ;;  %v498_v28 = vpop.f32.mrb[19].mxu0  ;;  %v756_v29 = vor.u32 %v754_v6, %v753_v17  ;;  %v758_v30 = vrot.slane %v753_v17, 4  ;;  %v739_v31 = vor.u32 %v737_v8, %v736_v18  ;;  %v922_v17 = vld [vmem:[#allocation2 + $0x6c] sm:$0xf] }
 0x115   : > { %v741_v32 = vrot.slane %v736_v18, 4  ;;  %v779_v33 = vrot.slane %v777_v24, 7  ;;  %v762_v34 = vrot.slane %v760_v26, 7  ;;  %v4399_v36 = vpack.c.bf16 %v525_v13, %v525_v13  ;;  %v915_v18 = vld [vmem:[#allocation2 + $0x60] sm:$0xf] }
 0x116   : > { %v4397_v37 = vpack.c.bf16 %v523_v15, %v523_v15  ;;  %v757_v38 = vsel %vm5429_vm10, %v749_v53, %v756_v29  ;;  %v899_v39 = vsel %vm5362_vm4, %v758_v30, %v898_v10  ;;  %v740_v40 = vsel %vm5429_vm10, %v732_v55, %v739_v31 }
 0x117   : > { %v892_v41 = vsel %vm5362_vm4, %v741_v32, %v891_v19  ;;  %897 = vst [vmem:[#allocation2 + $0x40] sm:$0xf] %v757_v38  ;;  %900 = vst [vmem:[#allocation2 + $0x44] sm:$0x1] %v899_v39  ;;  %v782_v44 = vor.u32 %v780_v25, %v779_v33  ;;  %v765_v45 = vor.u32 %v763_v27, %v762_v34  ;;  %v783_v46 = vrot.slane %v779_v33, 4 }
 0x118   : > { %890 = vst [vmem:[#allocation2 + $0x34] sm:$0xf] %v740_v40  ;;  %893 = vst [vmem:[#allocation2 + $0x38] sm:$0x1] %v892_v41  ;;  %v766_v47 = vrot.slane %v762_v34, 4  ;;  %v785_v48 = vshrl.u32 %v4399_v36, 16  ;;  %v507_v63 = vadd.f32 %v4649_v23, %v5414_v56  ;;  %v499_v0 = vadd.f32 %v5414_v56, %v498_v28 }
 0x119   : > { %v768_v49 = vshrl.u32 %v4397_v37, 16  ;;  %v909_v50 = vsel %vm5422_vm9, %v782_v44, %v908_v42  ;;  %v902_v51 = vsel %vm5422_vm9, %v765_v45, %v901_v43  ;;  %v528_v52 = vmax.f32 %v504_v21, 0.0  ;;  %v926_v34 = vld [vmem:[#allocation2 + $0x74] sm:$0x1]  ;;  %v933_v45 = vld [vmem:[#allocation2] sm:$0xf] (!%p4067_p8) }
 0x11a   : > { %v526_v53 = vmax.f32 %v496_v22, 0.0  ;;  %910 = vst [vmem:[#allocation2 + $0x54] sm:$0xf] %v909_v50  ;;  %903 = vst [vmem:[#allocation2 + $0x48] sm:$0xf] %v902_v51  ;;  %v787_v54 = vrot.slane %v785_v48, 7 }
 0x11b   : > { %v788_v55 = vshll.u32 %v4399_v36, 16  ;;  %v770_v57 = vrot.slane %v768_v49, 7  ;;  %v771_v58 = vshll.u32 %v4397_v37, 16  ;;  %v4402_v61 = vpack.c.bf16 %v528_v52, %v528_v52  ;;  %v919_v36 = vld [vmem:[#allocation2 + $0x68] sm:$0x1] }
 0x11c   : > { %v4400_v62 = vpack.c.bf16 %v526_v53, %v526_v53  ;;  %v792_v2 = vrot.slane %v787_v54, 4  ;;  %v529_v15 = vmax.f32 %v507_v63, 0.0  ;;  %v527_v16 = vmax.f32 %v499_v0, 0.0 }
 0x11d   : > { %v790_v1 = vor.u32 %v788_v55, %v787_v54  ;;  %v773_v3 = vor.u32 %v771_v58, %v770_v57  ;;  %v775_v4 = vrot.slane %v770_v57, 4  ;;  %v811_v5 = vshrl.u32 %v4402_v61, 16 }
 0x11e   : > { %v814_v6 = vshll.u32 %v4402_v61, 16  ;;  %v794_v7 = vshrl.u32 %v4400_v62, 16  ;;  %v797_v8 = vshll.u32 %v4400_v62, 16  ;;  %v913_v10 = vsel %vm5362_vm4, %v792_v2, %v912_v59 }
 0x11f   : > { %v791_v9 = vsel %vm5429_vm10, %v783_v46, %v790_v1  ;;  %v774_v11 = vsel %vm5429_vm10, %v766_v47, %v773_v3  ;;  %v906_v56 = vsel %vm5362_vm4, %v775_v4, %v905_v60  ;;  %914 = vst [vmem:[#allocation2 + $0x5c] sm:$0x1] %v913_v10  ;;  %v813_v12 = vrot.slane %v811_v5, 7  ;;  %v937_v46 = vld [vmem:[#allocation2 + $0x8] sm:$0x1] (!%p4067_p8) }
 0x120   : > { %911 = vst [vmem:[#allocation2 + $0x58] sm:$0xf] %v791_v9  ;;  %904 = vst [vmem:[#allocation2 + $0x4c] sm:$0xf] %v774_v11  ;;  %v796_v13 = vrot.slane %v794_v7, 7  ;;  %v4403_v22 = vpack.c.bf16 %v529_v15, %v529_v15  ;;  %v4401_v23 = vpack.c.bf16 %v527_v16, %v527_v16  ;;  %v934_v47 = vsel (!%p4067_p8), %vm5422_vm9, 0, %v933_v45 }
 0x121   : > { %907 = vst [vmem:[#allocation2 + $0x50] sm:$0x1] %v906_v56  ;;  %v816_v19 = vor.u32 %v814_v6, %v813_v12  ;;  %v817_v32 = vrot.slane %v813_v12, 4  ;;  %v5263_v48 = vmov (!%p4067_p8), 0   ;;  %v938_v35 = vsel (!%p4067_p8), %vm5362_vm4, 0, %v937_v46 }
 0x122   : > { %v799_v21 = vor.u32 %v797_v8, %v796_v13  ;;  %v819_v26 = vshrl.u32 %v4403_v22, 16  ;;  %v802_v27 = vshrl.u32 %v4401_v23, 16  ;;  %v822_v29 = vshll.u32 %v4403_v22, 16  ;;  %936 = vst [vmem:[#allocation2 + $0x4] sm:$0xf] (!%p4067_p8), %v5263_v48 }
 0x123   : > { %v923_v24 = vsel %vm5422_vm9, %v816_v19, %v922_v17  ;;  %v805_v31 = vshll.u32 %v4401_v23, 16  ;;  %v800_v33 = vrot.slane %v796_v13, 4  ;;  %935 = vst [vmem:[#allocation2] sm:$0xf] (!%p4067_p8), %v934_v47  ;;  %939 = vst [vmem:[#allocation2 + $0x8] sm:$0x1] (!%p4067_p8), %v938_v35 }
 0x124   : > { %v916_v25 = vsel %vm5422_vm9, %v799_v21, %v915_v18  ;;  %924 = vst [vmem:[#allocation2 + $0x6c] sm:$0xf] %v923_v24  ;;  %v821_v28 = vrot.slane %v819_v26, 7  ;;  %v804_v30 = vrot.slane %v802_v27, 7  ;;  %932 = sbr.rel (%p4067_p8) target bundleno = 299 (0x12b), region = 44 }
 0x125   : > { %917 = vst [vmem:[#allocation2 + $0x60] sm:$0xf] %v916_v25 }
 0x126   : > { %v824_v37 = vor.u32 %v822_v29, %v821_v28  ;;  %v826_v38 = vrot.slane %v821_v28, 4  ;;  %v807_v39 = vor.u32 %v805_v31, %v804_v30  ;;  %v809_v40 = vrot.slane %v804_v30, 4 }
 0x128   : > { %v825_v41 = vsel %vm5429_vm10, %v817_v32, %v824_v37  ;;  %v927_v42 = vsel %vm5362_vm4, %v826_v38, %v926_v34  ;;  %v808_v43 = vsel %vm5429_vm10, %v800_v33, %v807_v39  ;;  %v920_v44 = vsel %vm5362_vm4, %v809_v40, %v919_v36 }
 0x129   : > { %925 = vst [vmem:[#allocation2 + $0x70] sm:$0xf] %v825_v41  ;;  %928 = vst [vmem:[#allocation2 + $0x74] sm:$0x1] %v927_v42 }
 0x12a   : > { %918 = vst [vmem:[#allocation2 + $0x64] sm:$0xf] %v808_v43  ;;  %921 = vst [vmem:[#allocation2 + $0x68] sm:$0x1] %v920_v44 }
 0x12b PF: > { %p4068_p9 = scmp.ne.s32.totalorder %s5245_s18, 1 }
 0x12c   : > { %v945_v49 = vld [vmem:[#allocation2 + $0x6c] sm:$0xf] (!%p4068_p9)  ;;  %v5264_v52 = vmov (!%p4068_p9), 0  }
 0x12d   : > { %943 = sbr.rel (%p4068_p9) target bundleno = 308 (0x134), region = 48  ;;  %v946_v51 = vsel (!%p4068_p9), %vm5422_vm9, 0, %v945_v49  ;;  %948 = vst [vmem:[#allocation2 + $0x70] sm:$0xf] (!%p4068_p9), %v5264_v52 }
 0x12e   : > { %947 = vst [vmem:[#allocation2 + $0x6c] sm:$0xf] (!%p4068_p9), %v946_v51 }
 0x130   : > { %v949_v50 = vld [vmem:[#allocation2 + $0x74] sm:$0x1] (!%p4068_p9) }
 0x131   : > { %v950_v53 = vsel (!%p4068_p9), %vm5362_vm4, 0, %v949_v50 }
 0x132   : > { %951 = vst [vmem:[#allocation2 + $0x74] sm:$0x1] (!%p4068_p9), %v950_v53 }
 0x134 PF: > { %v5123_v54 = vld [vmem:[%s6416_s3 + $0x40] sm:$0xff]   ;;  %v5125_v20 = vld [vmem:[%s6416_s3 + $0x48] sm:$0xff]   ;;  %v5127_v57 = vld [vmem:[%s6416_s3 + $0x50] sm:$0xff]   ;;  %vm992_vm11 = vsmask.f32 3328  ;;  %vm1598_vm14 = vcmask 1042432  }
 0x135   : > { %v5124_v55 = vld [vmem:[%s6416_s3 + $0x100] sm:$0xff]   ;;  %4650 = vmatprep.subr.bf16.mxu0 %v5123_v54  ;;  %v5126_v14 = vld [vmem:[%s6416_s3 + $0x108] sm:$0xff]   ;;  %v5128_v58 = vld [vmem:[%s6416_s3 + $0x110] sm:$0xff]   ;;  %vm993_vm12 = vsmask.f32 7440  ;;  %vm1599_vm15 = vcmask 1046532  }
 0x136   : > { %4778 = vmatprep.subr.bf16.mxu1 %v5124_v55  ;;  %4651 = vmatpush3.bf16.msra.mxu0 %v5123_v54  ;;  %v5129_v59 = vld [vmem:[%s6416_s3 + $0x58] sm:$0xff]   ;;  %v5131_v61 = vld [vmem:[%s6416_s3 + $0x60] sm:$0xff]   ;;  %v5133_v63 = vld [vmem:[%s6416_s3 + $0x68] sm:$0xff]  }
 0x137   : > { %4779 = vmatpush3.bf16.msra.mxu1 %v5124_v55  ;;  %4652 = vmatprep.subr.bf16.mxu0 %v5125_v20  ;;  %v5130_v60 = vld [vmem:[%s6416_s3 + $0x118] sm:$0xff]   ;;  %v5132_v62 = vld [vmem:[%s6416_s3 + $0x120] sm:$0xff]   ;;  %v5134_v0 = vld [vmem:[%s6416_s3 + $0x128] sm:$0xff]  }
 0x138   : > { %4780 = vmatprep.subr.bf16.mxu1 %v5126_v14  ;;  %v5565_v1 = vld [vmem:[#allocation2] sm:$0xf]  ;;  %v5567_v2 = vld [vmem:[#allocation2 + $0x4] sm:$0xf]  ;;  %v5569_v3 = vld [vmem:[#allocation2 + $0x8] sm:$0x1] }
 0x139   : > { %v996_v4 = vshrl.u32 %v5565_v1, 16  ;;  %v999_v5 = vshll.u32 %v5565_v1, 16  ;;  %v1005_v6 = vshll.u32 %v5567_v2, 16  ;;  %v1009_v7 = vshrl.u32 %v5567_v2, 16  ;;  %v2110_v9 = vld [vmem:[#allocation2 + $0xc] sm:$0xf]  ;;  %vm5595_vm13 = vmor %vm992_vm11, %vm993_vm12 }
 0x13a   : > { %4653 = vmatpush3.bf16.msra.mxu0 %v5125_v20  ;;  %v1015_v8 = vshll.u32 %v5569_v3, 16  ;;  %v5576_v56 = vld [vmem:[#allocation2 + $0x10] sm:$0xf]  ;;  %v5578_v12 = vld [vmem:[#allocation2 + $0x14] sm:$0x1]  ;;  %v2135_v17 = vshrl.u32 %v2110_v9, 16  ;;  %vm5850_vm0 = vmor %vm1598_vm14, %vm1599_vm15 }
 0x13b   : > { %4781 = vmatpush3.bf16.msra.mxu1 %v5126_v14  ;;  %4654 = vmatprep.subr.bf16.mxu0 %v5127_v57  ;;  %v998_v10 = vrot.slane %v996_v4, 4  ;;  %v1001_v11 = vrot.slane %v999_v5, 5  ;;  %v5135_v13 = vld [vmem:[%s6416_s3 + $0x70] sm:$0xff]   ;;  %v1007_v15 = vrot.slane %v1005_v6, 5  ;;  %v1011_v16 = vrot.slane %v1009_v7, 4  ;;  %v5137_v25 = vld [vmem:[%s6416_s3 + $0x78] sm:$0xff]  }
 0x13c   : > { %4782 = vmatprep.subr.bf16.mxu1 %v5128_v58  ;;  %v5136_v18 = vld [vmem:[%s6416_s3 + $0x130] sm:$0xff]   ;;  %v2138_v21 = vshll.u32 %v2110_v9, 16  ;;  %v2144_v22 = vshll.u32 %v5576_v56, 16  ;;  %v2148_v23 = vshrl.u32 %v5576_v56, 16  ;;  %v5588_v24 = vld [vmem:[#allocation2 + $0xc] sm:$0xf] }
 0x13d   : > { %v1002_v19 = vor.u32 %v1001_v11, %v998_v10  ;;  %v1012_v27 = vor.u32 %v1011_v16, %v1007_v15  ;;  %v1017_v28 = vrot.slane %v1015_v8, 5  ;;  %v2137_v29 = vrot.slane %v2135_v17, 4  ;;  %v5600_v31 = vld [vmem:[#allocation2 + $0x10] sm:$0xf]  ;;  %v5138_v41 = vld [vmem:[%s6416_s3 + $0x138] sm:$0xff]   ;;  %v5139_v20 = vld [vmem:[%s6416_s3] sm:$0xff]  }
 0x13e   : > { %4655 = vmatpush3.bf16.msra.mxu0 %v5127_v57  ;;  %v2154_v30 = vshll.u32 %v5578_v12, 16  ;;  %v2140_v33 = vrot.slane %v2138_v21, 5  ;;  %v2146_v34 = vrot.slane %v2144_v22, 5  ;;  %v2150_v36 = vrot.slane %v2148_v23, 4  ;;  %v5609_v45 = vld [vmem:[#allocation2 + $0x14] sm:$0x1] }
 0x13f   : > { %4783 = vmatpush3.bf16.msra.mxu1 %v5128_v58  ;;  %4656 = vmatprep.subr.bf16.mxu0 %v5129_v59  ;;  %v1003_v32 = vrot.slane %v1002_v19, 4  ;;  %v1013_v37 = vrot.slane %v1012_v27, 4  ;;  %v1020_v39 = vshrl.u32 %v5588_v24, 16  ;;  %v1023_v40 = vshll.u32 %v5588_v24, 16  ;;  %v2113_v47 = vld [vmem:[#allocation2 + $0x18] sm:$0xf] }
 0x140   : > { %4784 = vmatprep.subr.bf16.mxu1 %v5130_v60  ;;  %v2156_v38 = vrot.slane %v2154_v30, 5  ;;  %v2141_v43 = vor.u32 %v2140_v33, %v2137_v29  ;;  %v2151_v44 = vor.u32 %v2150_v36, %v2146_v34  ;;  %v1029_v46 = vshll.u32 %v5600_v31, 16  ;;  %v5615_v51 = vld [vmem:[#allocation2 + $0x1c] sm:$0xf]  ;;  %v5623_v14 = vld [vmem:[%s6416_s3 + $0x140] sm:$0xff]  }
 0x141   : > { %v1008_v42 = vsel %vm5595_vm13, %v1003_v32, %v1007_v15  ;;  %v1018_v48 = vsel %vm5595_vm13, %v1013_v37, %v1017_v28  ;;  %v1022_v35 = vrot.slane %v1020_v39, 4  ;;  %v1025_v49 = vrot.slane %v1023_v40, 5  ;;  %v5641_v23 = vld [vmem:[#allocation2 + $0x1c] sm:$0xf]  ;;  %v2116_v32 = vld [vmem:[#allocation2 + $0x24] sm:$0xf] }
 0x142   : > { %4657 = vmatpush3.bf16.msra.mxu0 %v5129_v59  ;;  %v1033_v50 = vshrl.u32 %v5600_v31, 16  ;;  %v4085_v52 = vcombine.low %v1008_v42, %v1018_v48  ;;  %v2142_v53 = vrot.slane %v2141_v43, 4  ;;  %v2152_v54 = vrot.slane %v2151_v44, 4  ;;  %v5141_v37 = vld [vmem:[%s6416_s3 + $0x8] sm:$0xff]  }
 0x143   : > { %4785 = vmatpush3.bf16.msra.mxu1 %v5130_v60  ;;  %4658 = vmatprep.subr.bf16.mxu0 %v5131_v61  ;;  %v1031_v55 = vrot.slane %v1029_v46, 5  ;;  %v1026_v57 = vor.u32 %v1025_v49, %v1022_v35  ;;  %v1039_v59 = vshll.u32 %v5609_v45, 16  ;;  %v5626_v60 = vld [vmem:[#allocation2 + $0x20] sm:$0x1]  ;;  %v2168_v10 = vshll.u32 %v5615_v51, 16  ;;  %v5143_v49 = vld [vmem:[%s6416_s3 + $0x10] sm:$0xff]  }
 0x144   : > { %4786 = vmatprep.subr.bf16.mxu1 %v5132_v62  ;;  %v1035_v58 = vrot.slane %v1033_v50, 4  ;;  %4666 = vmatprep.mubr.bf16.mxu0 %v4085_v52  ;;  %v2172_v11 = vshrl.u32 %v5615_v51, 16  ;;  %v1053_v40 = vshll.u32 %v5641_v23, 16  ;;  %v5653_v43 = vld [vmem:[#allocation2 + $0x28] sm:$0xf]  ;;  %v2183_v35 = vshrl.u32 %v2116_v32, 16 }
 0x145   : > { %v1027_v5 = vrot.slane %v1026_v57, 4  ;;  %v1041_v7 = vrot.slane %v1039_v59, 5  ;;  %v2170_v21 = vrot.slane %v2168_v10, 5  ;;  %v5657_v48 = vld [vmem:[#allocation2 + $0x2c] sm:$0x1] }
 0x146   : > { %4659 = vmatpush3.bf16.msra.mxu0 %v5131_v61  ;;  %v2147_v61 = vsel %vm5595_vm13, %v2142_v53, %v2146_v34  ;;  %v1036_v6 = vor.u32 %v1035_v58, %v1031_v55  ;;  %v2174_v22 = vrot.slane %v2172_v11, 4  ;;  %v5142_v50 = vld [vmem:[%s6416_s3 + $0x148] sm:$0xff]   ;;  %v1055_v52 = vrot.slane %v1053_v40, 5  ;;  %v5665_v57 = vld [vmem:[#allocation2 + $0x24] sm:$0xf] }
 0x147   : > { %4787 = vmatpush3.bf16.msra.mxu1 %v5132_v62  ;;  %4660 = vmatprep.subr.bf16.mxu0 %v5133_v63  ;;  %v2157_v62 = vsel %vm5595_vm13, %v2152_v54, %v2156_v38  ;;  %v1032_v16 = vsel %vm5595_vm13, %v1027_v5, %v1031_v55  ;;  %v2186_v55 = vshll.u32 %v2116_v32, 16  ;;  %v5671_v5 = vld [vmem:[#allocation2 + $0x28] sm:$0xf]  ;;  %v1068_v10 = vshrl.u32 %v5665_v57, 16  ;;  %v2119_v11 = vld [vmem:[#allocation2 + $0x30] sm:$0xf] }
 0x148   : > { %4788 = vmatprep.subr.bf16.mxu1 %v5134_v0  ;;  %v4205_v4 = vcombine.low %v2147_v61, %v2157_v62  ;;  %v1037_v17 = vrot.slane %v1036_v6, 4  ;;  %v2175_v36 = vor.u32 %v2174_v22, %v2170_v21  ;;  %v2185_v61 = vrot.slane %v2183_v35, 4  ;;  %v5673_v6 = vld [vmem:[#allocation2 + $0x2c] sm:$0x1]  ;;  %v5144_v22 = vld [vmem:[%s6416_s3 + $0x150] sm:$0xff]   ;;  %v5145_v32 = vld [vmem:[%s6416_s3 + $0x18] sm:$0xff]  }
 0x149   : > { %v2192_v62 = vshll.u32 %v5653_v43, 16  ;;  %v1087_v40 = vshll.u32 %v5673_v6, 16  ;;  %v5146_v35 = vld [vmem:[%s6416_s3 + $0x158] sm:$0xff]  }
 0x14a   : > { %4661 = vmatpush3.bf16.msra.mxu0 %v5133_v63  ;;  %v2159_v63 = vshrl.u32 %v2113_v47, 16  ;;  %4794 = vmatprep.mubr.bf16.mxu1 %v4205_v4  ;;  %v1042_v27 = vsel %vm5595_vm13, %v1037_v17, %v1041_v7  ;;  %v2176_v46 = vrot.slane %v2175_v36, 4  ;;  %v2196_v4 = vshrl.u32 %v5653_v43, 16 }
 0x14b   : > { %4789 = vmatpush3.bf16.msra.mxu1 %v5134_v0  ;;  %4662 = vmatprep.subr.bf16.mxu0 %v5135_v13  ;;  %v2162_v0 = vshll.u32 %v2113_v47, 16  ;;  %v4086_v33 = vcombine.low %v1032_v16, %v1042_v27 }
 0x14c   : > { %4790 = vmatprep.subr.bf16.mxu1 %v5136_v18  ;;  %v2161_v8 = vrot.slane %v2159_v63, 4 }
 0x14d   : > { %v2164_v9 = vrot.slane %v2162_v0, 5  ;;  %v2188_v0 = vrot.slane %v2186_v55, 5 }
 0x14e   : > { %4663 = vmatpush3.bf16.msra.mxu0 %v5135_v13  ;;  %v5634_v13 = vld [vmem:[#allocation2 + $0x18] sm:$0xf] }
 0x14f   : > { %4791 = vmatpush3.bf16.msra.mxu1 %v5136_v18  ;;  %4664 = vmatprep.subr.bf16.mxu0 %v5137_v25  ;;  %v2178_v18 = vshll.u32 %v5626_v60, 16  ;;  %v2165_v19 = vor.u32 %v2164_v9, %v2161_v8  ;;  %v1044_v30 = vshrl.u32 %v5634_v13, 16  ;;  %v1047_v38 = vshll.u32 %v5634_v13, 16 }
 0x150   : > { %4792 = vmatprep.subr.bf16.mxu1 %v5138_v41  ;;  %v2194_v8 = vrot.slane %v2192_v62, 5  ;;  %v2202_v9 = vshll.u32 %v5657_v48, 16  ;;  %v2189_v17 = vor.u32 %v2188_v0, %v2185_v61 }
 0x151   : > { %v2180_v28 = vrot.slane %v2178_v18, 5  ;;  %v2166_v34 = vrot.slane %v2165_v19, 4  ;;  %v1046_v39 = vrot.slane %v1044_v30, 4  ;;  %v1049_v47 = vrot.slane %v1047_v38, 5 }
 0x152   : > { %4665 = vmatpush3.bf16.msra.mxu0 %v5137_v25  ;;  %v986_v25 = vld [vmem:[#allocation2 + $0x20] sm:$0x1]  ;;  %v2198_v18 = vrot.slane %v2196_v4, 4  ;;  %v1071_v19 = vshll.u32 %v5665_v57, 16  ;;  %v2204_v27 = vrot.slane %v2202_v9, 5  ;;  %v1077_v30 = vshll.u32 %v5671_v5, 16 }
 0x153   : > { %4793 = vmatpush3.bf16.msra.mxu1 %v5138_v41  ;;  %4682 = vmatprep.subr.bf16.mxu0 %v5139_v20  ;;  %v1057_v41 = vshrl.u32 %v5641_v23, 16  ;;  %v1063_v42 = vshll.u32 %v986_v25, 16  ;;  %v2171_v44 = vsel %vm5595_vm13, %v2166_v34, %v2170_v21  ;;  %v2181_v58 = vsel %vm5595_vm13, %v2176_v46, %v2180_v28  ;;  %v5678_v21 = vld [vmem:[#allocation2 + $0x34] sm:$0xf]  ;;  %v5696_v46 = vld [vmem:[#allocation2 + $0x38] sm:$0x1] }
 0x154   : > { %4810 = vmatprep.subr.bf16.mxu1 %v5623_v14  ;;  %v1050_v59 = vor.u32 %v1049_v47, %v1046_v39  ;;  %v4206_v63 = vcombine.low %v2171_v44, %v2181_v58  ;;  %v1070_v28 = vrot.slane %v1068_v10, 4  ;;  %v2190_v34 = vrot.slane %v2189_v17, 4  ;;  %v5702_v58 = vld [vmem:[#allocation2 + $0x30] sm:$0xf] }
 0x155   : > { %4667 = vmatmul.mubr.bf16.vlgmr.msra.gmra.mrb[20].mxu0 %v4086_v33  ;;  %v1059_v53 = vrot.slane %v1057_v41, 4  ;;  %v1065_v54 = vrot.slane %v1063_v42, 5  ;;  %v2199_v36 = vor.u32 %v2198_v18, %v2194_v8  ;;  %v1079_v38 = vrot.slane %v1077_v30, 5  ;;  %v5716_v18 = vld [vmem:[#allocation2 + $0x38] sm:$0x1] }
 0x156   : > { %4683 = vmatpush3.bf16.msra.mxu0 %v5139_v20  ;;  %v1051_v7 = vrot.slane %v1050_v59, 4  ;;  %4795 = vmatmul.mubr.bf16.vlgmr.msra.gmra.mrb[0].mxu1 %v4206_v63  ;;  %v1081_v39 = vshrl.u32 %v5671_v5, 16  ;;  %v2195_v41 = vsel %vm5595_vm13, %v2190_v34, %v2194_v8  ;;  %v2207_v47 = vshrl.u32 %v2119_v11, 16  ;;  %v5707_v63 = vld [vmem:[#allocation2 + $0x34] sm:$0xf] }
 0x157   : > { %4684 = vmatprep.subr.bf16.mxu0 %v5141_v37  ;;  %v1060_v20 = vor.u32 %v1059_v53, %v1055_v52  ;;  %4811 = vmatpush3.bf16.msra.mxu1 %v5623_v14  ;;  %v2200_v42 = vrot.slane %v2199_v36, 4  ;;  %v1089_v53 = vrot.slane %v1087_v40, 5  ;;  %v2216_v55 = vshll.u32 %v5678_v21, 16  ;;  %v2122_v34 = vld [vmem:[#allocation2 + $0x3c] sm:$0xf] }
 0x158   : > { %v1056_v25 = vsel %vm5595_vm13, %v1051_v7, %v1055_v52  ;;  %4812 = vmatprep.subr.bf16.mxu1 %v5142_v50  ;;  %v1083_v52 = vrot.slane %v1081_v39, 4  ;;  %v2209_v62 = vrot.slane %v2207_v47, 4  ;;  %v2226_v10 = vshll.u32 %v5696_v46, 16  ;;  %v5729_v39 = vld [vmem:[#allocation2 + $0x40] sm:$0xf]  ;;  %v5151_v47 = vld [vmem:[%s6416_s3 + $0x30] sm:$0xff]  }
 0x159   : > { %v1061_v16 = vrot.slane %v1060_v20, 4  ;;  %v2205_v59 = vsel %vm5595_vm13, %v2200_v42, %v2204_v27  ;;  %v2218_v7 = vrot.slane %v2216_v55, 5  ;;  %v5149_v27 = vld [vmem:[%s6416_s3 + $0x28] sm:$0xff]   ;;  %v2231_v55 = vshrl.u32 %v2122_v34, 16 }
 0x15a   : > { %4685 = vmatpush3.bf16.msra.mxu0 %v5141_v37  ;;  %v1073_v37 = vrot.slane %v1071_v19, 5  ;;  %v4207_v20 = vcombine.low %v2195_v41, %v2205_v59  ;;  %v1084_v0 = vor.u32 %v1083_v52, %v1079_v38  ;;  %v1095_v19 = vshll.u32 %v5702_v58, 16 }
 0x15b   : > { %4686 = vmatprep.subr.bf16.mxu0 %v5143_v49  ;;  %v1066_v33 = vsel %vm5595_vm13, %v1061_v16, %v1065_v54  ;;  %4813 = vmatpush3.bf16.msra.mxu1 %v5142_v50  ;;  %v2210_v54 = vshll.u32 %v2119_v11, 16  ;;  %v5147_v50 = vld [vmem:[%s6416_s3 + $0x20] sm:$0xff]   ;;  %v1092_v11 = vshrl.u32 %v5702_v58, 16  ;;  %v2228_v30 = vrot.slane %v2226_v10, 5 }
 0x15c   : > { %v4087_v14 = vcombine.low %v1056_v25, %v1066_v33  ;;  %v1074_v44 = vor.u32 %v1073_v37, %v1070_v28  ;;  %4814 = vmatprep.subr.bf16.mxu1 %v5144_v22  ;;  %4798 = vmatprep.mubr.bf16.mxu1 %v4207_v20  ;;  %v1085_v16 = vrot.slane %v1084_v0, 4  ;;  %v1101_v25 = vshll.u32 %v5707_v63, 16  ;;  %v5745_v0 = vld [vmem:[#allocation2 + $0x3c] sm:$0xf]  ;;  %v5749_v10 = vld [vmem:[#allocation2 + $0x44] sm:$0x1] }
 0x15d   : > { %v2212_v4 = vrot.slane %v2210_v54, 5  ;;  %v1105_v33 = vshrl.u32 %v5707_v63, 16  ;;  %v5737_v54 = vld [vmem:[#allocation2 + $0x44] sm:$0x1]  ;;  %v2234_v59 = vshll.u32 %v2122_v34, 16  ;;  %v2240_v20 = vshll.u32 %v5729_v39, 16 }
 0x15e   : > { %4687 = vmatpush3.bf16.msra.mxu0 %v5143_v49  ;;  %4670 = vmatprep.mubr.bf16.mxu0 %v4087_v14  ;;  %v1075_v61 = vrot.slane %v1074_v44, 4  ;;  %v2220_v49 = vshrl.u32 %v5678_v21, 16  ;;  %v1090_v36 = vsel %vm5595_vm13, %v1085_v16, %v1089_v53  ;;  %v1097_v14 = vrot.slane %v1095_v19, 5  ;;  %6431 = vst [vmem:[#allocation3_spill] sm:$0xff] %v5749_v10 }
 0x15f   : > { %4688 = vmatprep.subr.bf16.mxu0 %v5145_v32  ;;  %v2213_v17 = vor.u32 %v2212_v4, %v2209_v62  ;;  %4815 = vmatpush3.bf16.msra.mxu1 %v5144_v22  ;;  %v5148_v22 = vld [vmem:[%s6416_s3 + $0x160] sm:$0xff]   ;;  %v1107_v42 = vrot.slane %v1105_v33, 4  ;;  %v1111_v44 = vshll.u32 %v5716_v18, 16  ;;  %v2244_v19 = vshrl.u32 %v5729_v39, 16 }
 0x160   : > { %v1080_v8 = vsel %vm5595_vm13, %v1075_v61, %v1079_v38  ;;  %v2222_v9 = vrot.slane %v2220_v49, 4  ;;  %4816 = vmatprep.subr.bf16.mxu1 %v5146_v35  ;;  %v1103_v38 = vrot.slane %v1101_v25, 5  ;;  %v5150_v61 = vld [vmem:[%s6416_s3 + $0x168] sm:$0xff]   ;;  %v2250_v25 = vshll.u32 %v5737_v54, 16 }
 0x161   : > { %v2214_v37 = vrot.slane %v2213_v17, 4  ;;  %v4088_v40 = vcombine.low %v1080_v8, %v1090_v36  ;;  %v2233_v8 = vrot.slane %v2231_v55, 4  ;;  %v2242_v17 = vrot.slane %v2240_v20, 5  ;;  %v5760_v36 = vld [vmem:[#allocation2 + $0x4c] sm:$0xf] }
 0x162   : > { %4689 = vmatpush3.bf16.msra.mxu0 %v5145_v32  ;;  %v2223_v28 = vor.u32 %v2222_v9, %v2218_v7  ;;  %v1094_v32 = vrot.slane %v1092_v11, 4  ;;  %v1108_v49 = vor.u32 %v1107_v42, %v1103_v38  ;;  %v2236_v9 = vrot.slane %v2234_v59, 5  ;;  %v5153_v11 = vld [vmem:[%s6416_s3 + $0x38] sm:$0xff]  }
 0x163   : > { %4690 = vmatprep.subr.bf16.mxu0 %v5147_v50  ;;  %v2219_v52 = vsel %vm5595_vm13, %v2214_v37, %v2218_v7  ;;  %4817 = vmatpush3.bf16.msra.mxu1 %v5146_v35  ;;  %v5747_v35 = vld [vmem:[#allocation2 + $0x40] sm:$0xf]  ;;  %v1116_v33 = vshrl.u32 %v5745_v0, 16  ;;  %v1119_v34 = vshll.u32 %v5745_v0, 16 }
 0x164   : > { %v2224_v41 = vrot.slane %v2223_v28, 4  ;;  %v1098_v53 = vor.u32 %v1097_v14, %v1094_v32  ;;  %4671 = vmatmul.mubr.bf16.gmra.mrb[24].mxu0 %v4088_v40  ;;  %4818 = vmatprep.subr.bf16.mxu1 %v5148_v22  ;;  %v1109_v16 = vrot.slane %v1108_v49, 4  ;;  %v2125_v28 = vld [vmem:[#allocation2 + $0x48] sm:$0xf]  ;;  %v2237_v32 = vor.u32 %v2236_v9, %v2233_v8 }
 0x165   : > { %v2246_v14 = vrot.slane %v2244_v19, 4  ;;  %v2252_v40 = vrot.slane %v2250_v25, 5  ;;  %v1129_v59 = vshrl.u32 %v5747_v35, 16  ;;  %v2255_v20 = vshrl.u32 %v2125_v28, 16 }
 0x166   : > { %4691 = vmatpush3.bf16.msra.mxu0 %v5147_v50  ;;  %v2229_v62 = vsel %vm5595_vm13, %v2224_v41, %v2228_v30  ;;  %v1113_v50 = vrot.slane %v1111_v44, 5  ;;  %v1099_v7 = vrot.slane %v1098_v53, 4  ;;  %v1125_v41 = vshll.u32 %v5747_v35, 16 }
 0x167   : > { %4692 = vmatprep.subr.bf16.mxu0 %v5149_v27  ;;  %v4208_v4 = vcombine.low %v2219_v52, %v2229_v62  ;;  %4819 = vmatpush3.bf16.msra.mxu1 %v5148_v22  ;;  %v2238_v42 = vrot.slane %v2237_v32, 4  ;;  %v1118_v44 = vrot.slane %v1116_v33, 4  ;;  %v5152_v52 = vld [vmem:[%s6416_s3 + $0x170] sm:$0xff]   ;;  %v2247_v53 = vor.u32 %v2246_v14, %v2242_v17  ;;  %v5784_v32 = vld [vmem:[#allocation2 + $0x48] sm:$0xf] }
 0x168   : > { %v1104_v30 = vsel %vm5595_vm13, %v1099_v7, %v1103_v38  ;;  %v1114_v37 = vsel %vm5595_vm13, %v1109_v16, %v1113_v50  ;;  %v1121_v38 = vrot.slane %v1119_v34, 5  ;;  %4820 = vmatprep.subr.bf16.mxu1 %v5150_v61  ;;  %v1127_v55 = vrot.slane %v1125_v41, 5  ;;  %v5772_v50 = vld [vmem:[#allocation2 + $0x50] sm:$0x1]  ;;  %v5777_v7 = vld [vmem:[%s6416_s3 + $0x80] sm:$0xff]  }
 0x169   : > { %4799 = vmatmul.mubr.bf16.gmra.mrb[4].mxu1 %v4208_v4  ;;  %v1135_v62 = vshll.u32 %v5749_v10, 16  ;;  %v2243_v22 = vsel %vm5595_vm13, %v2238_v42, %v2242_v17  ;;  %v2258_v4 = vshll.u32 %v2125_v28, 16  ;;  %v2248_v8 = vrot.slane %v2247_v53, 4  ;;  %v5154_v17 = vld [vmem:[%s6416_s3 + $0x178] sm:$0xff]   ;;  %v2128_v53 = vld [vmem:[#allocation2 + $0x54] sm:$0xf] }
 0x16a   : > { %4693 = vmatpush3.bf16.msra.mxu0 %v5149_v27  ;;  %v4089_v27 = vcombine.low %v1104_v30, %v1114_v37  ;;  %v1122_v49 = vor.u32 %v1121_v38, %v1118_v44  ;;  %v1131_v9 = vrot.slane %v1129_v59, 4  ;;  %v2257_v25 = vrot.slane %v2255_v20, 4  ;;  %v5793_v38 = vld [vmem:[#allocation2 + $0x50] sm:$0x1] }
 0x16b   : > { %4694 = vmatprep.subr.bf16.mxu0 %v5151_v47  ;;  %v1137_v16 = vrot.slane %v1135_v62, 5  ;;  %4821 = vmatpush3.bf16.msra.mxu1 %v5150_v61  ;;  %v2260_v30 = vrot.slane %v2258_v4, 5  ;;  %v2268_v28 = vshrl.u32 %v5760_v36, 16  ;;  %v2253_v33 = vsel %vm5595_vm13, %v2248_v8, %v2252_v40  ;;  %v5789_v61 = vld [vmem:[#allocation2 + $0x4c] sm:$0xf]  ;;  %6432 = vst [vmem:[#allocation4_spill] sm:$0xff] %v5793_v38 }
 0x16c   : > { %4674 = vmatprep.mubr.bf16.mxu0 %v4089_v27  ;;  %v1123_v19 = vrot.slane %v1122_v49, 4  ;;  %4822 = vmatprep.subr.bf16.mxu1 %v5152_v52  ;;  %v1132_v34 = vor.u32 %v1131_v9, %v1127_v55  ;;  %v2274_v14 = vshll.u32 %v5772_v50, 16  ;;  %v4209_v41 = vcombine.low %v2243_v22, %v2253_v33  ;;  %v5803_v4 = vld [vmem:[%s6416_s3 + $0x180] sm:$0xff]  }
 0x16d   : > { %v2261_v42 = vor.u32 %v2260_v30, %v2257_v25  ;;  %v2270_v44 = vrot.slane %v2268_v28, 4  ;;  %v1140_v62 = vshrl.u32 %v5784_v32, 16  ;;  %v1143_v49 = vshll.u32 %v5784_v32, 16 }
 0x16e   : > { %4695 = vmatpush3.bf16.msra.mxu0 %v5151_v47  ;;  %v2264_v47 = vshll.u32 %v5760_v36, 16  ;;  %v1128_v27 = vsel %vm5595_vm13, %v1123_v19, %v1127_v55  ;;  %v1133_v59 = vrot.slane %v1132_v34, 4  ;;  %v2276_v40 = vrot.slane %v2274_v14, 5  ;;  %4802 = vmatprep.mubr.bf16.mxu1 %v4209_v41  ;;  %v5808_v19 = vld [vmem:[#allocation2 + $0x58] sm:$0xf] }
 0x16f   : > { %4696 = vmatprep.subr.bf16.mxu0 %v5153_v11  ;;  %4823 = vmatpush3.bf16.msra.mxu1 %v5152_v52  ;;  %v1149_v20 = vshll.u32 %v5789_v61, 16  ;;  %v1153_v55 = vshrl.u32 %v5789_v61, 16  ;;  %v1142_v9 = vrot.slane %v1140_v62, 4  ;;  %v1159_v52 = vshll.u32 %v5793_v38, 16  ;;  %v5812_v34 = vld [vmem:[#allocation2 + $0x5c] sm:$0x1] }
 0x170   : > { %v2266_v37 = vrot.slane %v2264_v47, 5  ;;  %4824 = vmatprep.subr.bf16.mxu1 %v5154_v17  ;;  %v1138_v8 = vsel %vm5595_vm13, %v1133_v59, %v1137_v16  ;;  %v1145_v47 = vrot.slane %v1143_v49, 5  ;;  %v5814_v14 = vld [vmem:[#allocation2 + $0x54] sm:$0xf]  ;;  %v2279_v16 = vshrl.u32 %v2128_v53, 16 }
 0x171   : > { %v4090_v25 = vcombine.low %v1128_v27, %v1138_v8  ;;  %v1151_v33 = vrot.slane %v1149_v20, 5  ;;  %v5816_v59 = vld [vmem:[#allocation2 + $0x58] sm:$0xf]  ;;  %v2282_v62 = vshll.u32 %v2128_v53, 16  ;;  %v2292_v49 = vshrl.u32 %v5808_v19, 16 }
 0x172   : > { %4697 = vmatpush3.bf16.msra.mxu0 %v5153_v11  ;;  %v2262_v11 = vrot.slane %v2261_v42, 4  ;;  %v2271_v22 = vor.u32 %v2270_v44, %v2266_v37  ;;  %v1146_v41 = vor.u32 %v1145_v47, %v1142_v9  ;;  %v1155_v42 = vrot.slane %v1153_v55, 4  ;;  %v2131_v53 = vld [vmem:[#allocation2 + $0x60] sm:$0xf]  ;;  %v5836_v38 = vld [vmem:[#allocation2 + $0x68] sm:$0x1] }
 0x173   : > { %4714 = vmatprep.subr.bf16.mxu0 %v5777_v7  ;;  %v1161_v44 = vrot.slane %v1159_v52, 5  ;;  %4825 = vmatpush3.bf16.msra.mxu1 %v5154_v17  ;;  %v2281_v55 = vrot.slane %v2279_v16, 4  ;;  %v2284_v8 = vrot.slane %v2282_v62, 5  ;;  %v2294_v17 = vrot.slane %v2292_v49, 4  ;;  %v5824_v52 = vld [vmem:[#allocation2 + $0x5c] sm:$0x1] }
 0x174   : > { %v2267_v30 = vsel %vm5595_vm13, %v2262_v11, %v2266_v37  ;;  %v2272_v28 = vrot.slane %v2271_v22, 4  ;;  %4675 = vmatmul.mubr.bf16.gmra.mrb[28].mxu0 %v4090_v25  ;;  %v2288_v37 = vshll.u32 %v5808_v19, 16  ;;  %4842 = vmatprep.subr.bf16.mxu1 %v5803_v4  ;;  %v1147_v22 = vrot.slane %v1146_v41, 4  ;;  %v5831_v62 = vld [vmem:[#allocation2 + $0x64] sm:$0xf] }
 0x175   : > { %v1156_v20 = vor.u32 %v1155_v42, %v1151_v33  ;;  %v2298_v47 = vshll.u32 %v5812_v34, 16  ;;  %v2285_v41 = vor.u32 %v2284_v8, %v2281_v55  ;;  %v1177_v15 = vshrl.u32 %v5816_v59, 16  ;;  %v2536_v55 = vld [vmem:[#allocation2 + $0xc] sm:$0xe] }
 0x176   : > { %v2277_v27 = vsel %vm5595_vm13, %v2272_v28, %v2276_v40  ;;  %v2290_v9 = vrot.slane %v2288_v37, 5  ;;  %v1152_v40 = vsel %vm5595_vm13, %v1147_v22, %v1151_v33  ;;  %v1167_v28 = vshll.u32 %v5814_v14, 16 }
 0x177   : > { %v4210_v11 = vcombine.low %v2267_v30, %v2277_v27  ;;  %v1157_v25 = vrot.slane %v1156_v20, 4  ;;  %v1164_v30 = vshrl.u32 %v5814_v14, 16  ;;  %v2300_v16 = vrot.slane %v2298_v47, 5 }
 0x178   : > { %v2295_v42 = vor.u32 %v2294_v17, %v2290_v9  ;;  %v1173_v27 = vshll.u32 %v5816_v59, 16  ;;  %v2286_v22 = vrot.slane %v2285_v41, 4  ;;  %v1179_v17 = vrot.slane %v1177_v15, 4 }
 0x179   : > { %4803 = vmatmul.mubr.bf16.gmra.mrb[8].mxu1 %v4210_v11  ;;  %v1162_v37 = vsel %vm5595_vm13, %v1157_v25, %v1161_v44  ;;  %v1166_v49 = vrot.slane %v1164_v30, 4  ;;  %v1169_v11 = vrot.slane %v1167_v28, 5  ;;  %v1183_v47 = vshll.u32 %v5824_v52, 16 }
 0x17a   : > { %v4091_v33 = vcombine.low %v1152_v40, %v1162_v37  ;;  %v2296_v20 = vrot.slane %v2295_v42, 4  ;;  %v1175_v29 = vrot.slane %v1173_v27, 5  ;;  %v2303_v10 = vshrl.u32 %v2131_v53, 16 }
 0x17b   : > { %v1170_v8 = vor.u32 %v1169_v11, %v1166_v49  ;;  %v2291_v44 = vsel %vm5595_vm13, %v2286_v22, %v2290_v9  ;;  %v2306_v30 = vshll.u32 %v2131_v53, 16  ;;  %v2312_v40 = vshll.u32 %v5831_v62, 16 }
 0x17c   : > { %4678 = vmatprep.mubr.bf16.mxu0 %v4091_v33  ;;  %v2301_v25 = vsel %vm5595_vm13, %v2296_v20, %v2300_v16  ;;  %v1180_v42 = vor.u32 %v1179_v17, %v1175_v29  ;;  %v1185_v27 = vrot.slane %v1183_v47, 5  ;;  %v2305_v37 = vrot.slane %v2303_v10, 4  ;;  %v2537_v47 = vld [vmem:[#allocation2 + $0x18] sm:$0xe] }
 0x17d   : > { %v4211_v28 = vcombine.low %v2291_v44, %v2301_v25  ;;  %v1171_v41 = vrot.slane %v1170_v8, 4  ;;  %v2308_v49 = vrot.slane %v2306_v30, 5  ;;  %v2314_v15 = vrot.slane %v2312_v40, 5  ;;  %v2538_v44 = vld [vmem:[#allocation2 + $0x24] sm:$0xe] }
 0x17e   : > { %v2316_v11 = vshrl.u32 %v5831_v62, 16  ;;  %v1181_v9 = vrot.slane %v1180_v42, 4  ;;  %v2322_v22 = vshll.u32 %v5836_v38, 16  ;;  %v4221_v16 = vrot.slane %v2536_v55, 9 }
 0x17f   : > { %4806 = vmatprep.mubr.bf16.mxu1 %v4211_v28  ;;  %v1176_v33 = vsel %vm5595_vm13, %v1171_v41, %v1175_v29  ;;  %v2309_v53 = vor.u32 %v2308_v49, %v2305_v37  ;;  %v2570_v10 = vrot.slane %v5576_v56, 5  ;;  %v4101_v29 = vcombine.low %v5565_v1, %v5567_v2 }
 0x180   : > { %v2318_v20 = vrot.slane %v2316_v11, 4  ;;  %v1186_v17 = vsel %vm5595_vm13, %v1181_v9, %v1185_v27  ;;  %v2324_v40 = vrot.slane %v2322_v22, 5  ;;  %v2584_v27 = vrot.slane %v5653_v43, 5 }
 0x181   : > { %v4092_v25 = vcombine.low %v1176_v33, %v1186_v17  ;;  %v2310_v55 = vrot.slane %v2309_v53, 4  ;;  %v2571_v28 = vsel %vm5850_vm0, %v4221_v16, %v2570_v10  ;;  %v2572_v41 = vrot.slane %v2570_v10, 4  ;;  %v2539_v16 = vld [vmem:[#allocation2 + $0x30] sm:$0xe] }
 0x182   : > { %v2319_v30 = vor.u32 %v2318_v20, %v2314_v15  ;;  %v6435_v37 = vrot.slane %v5615_v51, 5  ;;  %v2580_v2 = vrot.slane %v5626_v60, 5  ;;  %v6436_v49 = vrot.slane %v5578_v12, 5 }
 0x183   : > { %4679 = vmatmul.mubr.bf16.gmra.mrb[32].mxu0 %v4092_v25  ;;  %v2315_v56 = vsel %vm5595_vm13, %v2310_v55, %v2314_v15  ;;  %v4222_v22 = vrot.slane %v2537_v47, 9  ;;  %v4223_v15 = vrot.slane %v2538_v44, 9  ;;  %v2586_v43 = vrot.slane %v2584_v27, 4  ;;  %v2540_v47 = vld [vmem:[#allocation2 + $0x3c] sm:$0xe]  ;;  %v5159_v25 = vld [vmem:[%s6416_s3 + $0x88] sm:$0xff]  }
 0x184   : > { %v2320_v42 = vrot.slane %v2319_v30, 4  ;;  %v2579_v1 = vrot.slane %v6435_v37, 4  ;;  %4698 = vmatprep.mubr.bf16.mxu0 %v4101_v29  ;;  %v2574_v11 = vsel %vm5850_vm0, %v2572_v41, %v6436_v49  ;;  %v2587_v20 = vrot.slane %v5657_v48, 5 }
 0x185   : > { %v4245_v9 = vcombine.low %v2571_v28, %v2574_v11  ;;  %v1606_v10 = vrot.slane %v5569_v3, 5  ;;  %v1613_v60 = vrot.slane %v5609_v45, 5  ;;  %v4102_v12 = vcombine.low %v5588_v24, %v5600_v31  ;;  %v5165_v11 = vld [vmem:[%s6416_s3 + $0x98] sm:$0xff]  }
 0x186   : > { %v2325_v33 = vsel %vm5595_vm13, %v2320_v42, %v2324_v40  ;;  %v2581_v17 = vsel %vm5850_vm0, %v2579_v1, %v2580_v2  ;;  %v4103_v29 = vcombine.low %v5634_v13, %v5641_v23  ;;  %v6437_v44 = vmov %v6435_v37  ;;  %v5895_v23 = vld [vmem:[#allocation2 + $0x48] sm:$0xe] }
 0x187   : > { %v4212_v53 = vcombine.low %v2315_v56, %v2325_v33  ;;  %v2578_v48 = vsel %vm5850_vm0, %v4222_v22, %v6437_v44  ;;  %v4224_v55 = vrot.slane %v2539_v16, 9  ;;  %v2591_v24 = vrot.slane %v5678_v21, 5  ;;  %v5160_v21 = vld [vmem:[%s6416_s3 + $0x188] sm:$0xff]  }
 0x188   : > { %v2598_v31 = vrot.slane %v5729_v39, 5  ;;  %v2585_v30 = vsel %vm5850_vm0, %v4223_v15, %v2584_v27  ;;  %v2588_v13 = vsel %vm5850_vm0, %v2586_v43, %v2587_v20  ;;  %v2594_v51 = vrot.slane %v5696_v46, 5  ;;  %v5904_v39 = vld [vmem:[#allocation2 + $0x54] sm:$0xe]  ;;  %v5906_v46 = vld [vmem:[#allocation2 + $0x60] sm:$0xe] }
 0x189   : > { %4807 = vmatmul.mubr.bf16.gmra.mrb[12].mxu1 %v4212_v53  ;;  %v4225_v40 = vrot.slane %v2540_v47, 9  ;;  %v2601_v28 = vrot.slane %v5737_v54, 5  ;;  %v2605_v41 = vrot.slane %v5760_v36, 5  ;;  %v4246_v56 = vcombine.low %v2578_v48, %v2581_v17  ;;  %v5932_v43 = vld [vmem:[#allocation2 + $0x4] sm:$0xf] }
 0x18a   : > { %4826 = vmatprep.mubr.bf16.mxu1 %v4245_v9  ;;  %v4247_v42 = vcombine.low %v2585_v30, %v2588_v13  ;;  %v2593_v27 = vrot.slane %v2591_v24, 4  ;;  %v2600_v37 = vrot.slane %v2598_v31, 4  ;;  %v4104_v54 = vcombine.low %v5665_v57, %v5671_v5  ;;  %v5169_v47 = vld [vmem:[%s6416_s3 + $0xa0] sm:$0xff]  }
 0x18b   : > { %4699 = vmatmul.mubr.bf16.vlgmr.msra.gmra.mrb[20].mxu0 %v4102_v12  ;;  %v2592_v1 = vsel %vm5850_vm0, %v4224_v55, %v2591_v24  ;;  %v4105_v2 = vcombine.low %v5702_v58, %v5707_v63  ;;  %v4226_v49 = vrot.slane %v5895_v23, 9  ;;  %v2607_v33 = vrot.slane %v2605_v41, 4  ;;  %v5164_v58 = vld [vmem:[%s6416_s3 + $0x190] sm:$0xff]   ;;  %v1574_v12 = vld [vmem:[#allocation2] sm:$0xe] }
 0x18c   : > { %4715 = vmatpush3.bf16.msra.mxu0 %v5777_v7  ;;  %4702 = vmatprep.mubr.bf16.mxu0 %v4103_v29  ;;  %v5163_v7 = vld [vmem:[%s6416_s3 + $0x90] sm:$0xff]   ;;  %v2608_v57 = vrot.slane %v5772_v50, 5  ;;  %v4227_v9 = vrot.slane %v5904_v39, 9  ;;  %v2612_v22 = vrot.slane %v5808_v19, 5  ;;  %v2615_v15 = vrot.slane %v5812_v34, 5 }
 0x18d   : > { %4716 = vmatprep.subr.bf16.mxu0 %v5159_v25  ;;  %v4228_v16 = vrot.slane %v5906_v46, 9  ;;  %v2619_v53 = vrot.slane %v5831_v62, 5  ;;  %v1603_v50 = vrot.slane %v5932_v43, 5  ;;  %v2595_v19 = vsel %vm5850_vm0, %v2593_v27, %v2594_v51  ;;  %v5953_v24 = vld [vmem:[#allocation2 + $0x10] sm:$0xf] }
 0x18e   : > { %v2599_v20 = vsel %vm5850_vm0, %v4225_v40, %v2598_v31  ;;  %v2602_v34 = vsel %vm5850_vm0, %v2600_v37, %v2601_v28  ;;  %v4248_v17 = vcombine.low %v2592_v1, %v2595_v19  ;;  %v2614_v44 = vrot.slane %v2612_v22, 4  ;;  %v1577_v23 = vld [vmem:[#allocation2 + $0x24] sm:$0xe]  ;;  %v5171_v28 = vld [vmem:[%s6416_s3 + $0xa8] sm:$0xff]   ;;  %v5982_v37 = vld [vmem:[#allocation2 + $0x18] sm:$0xe] }
 0x18f   : > { %v4249_v29 = vcombine.low %v2599_v20, %v2602_v34  ;;  %v2622_v48 = vrot.slane %v5836_v38, 5  ;;  %v4117_v55 = vrot.slane %v1574_v12, 9  ;;  %v1610_v31 = vrot.slane %v5953_v24, 5  ;;  %v5221_v19 = vld [vmem:[#allocation2 + $0x1c] sm:$0xf]  ;;  %v5176_v38 = vld [vmem:[%s6416_s3 + $0x1b0] sm:$0xff]  }
 0x190   : > { %4717 = vmatpush3.bf16.msra.mxu0 %v5159_v25  ;;  %v5951_v25 = vrot.slane %v2619_v53, 4  ;;  %v1624_v30 = vrot.slane %v5671_v5, 5  ;;  %v1605_v13 = vrot.slane %v1603_v50, 4  ;;  %v1627_v51 = vrot.slane %v5673_v6, 5  ;;  %v1579_v34 = vld [vmem:[#allocation2 + $0x3c] sm:$0xe] }
 0x191   : > { %4827 = vmatmul.mubr.bf16.vlgmr.msra.gmra.mrb[0].mxu1 %v4246_v56  ;;  %4718 = vmatprep.subr.bf16.mxu0 %v5163_v7  ;;  %v4106_v40 = vcombine.low %v5745_v0, %v5747_v35  ;;  %v4107_v56 = vcombine.low %v5784_v32, %v5789_v61  ;;  %v4120_v5 = vrot.slane %v1577_v23, 9  ;;  %v2606_v6 = vsel %vm5850_vm0, %v4226_v49, %v2605_v41  ;;  %v6438_v12 = vld [vmem:[#allocation3_spill] sm:$0xff]  ;;  %v1581_v24 = vld [vmem:[#allocation2 + $0x54] sm:$0xe] }
 0x192   : > { %4843 = vmatpush3.bf16.msra.mxu1 %v5803_v4  ;;  %4830 = vmatprep.mubr.bf16.mxu1 %v4247_v42  ;;  %v5166_v4 = vld [vmem:[%s6416_s3 + $0x198] sm:$0xff]   ;;  %v1626_v39 = vrot.slane %v1624_v30, 4  ;;  %v2609_v0 = vsel %vm5850_vm0, %v2607_v33, %v2608_v57  ;;  %v5170_v42 = vld [vmem:[%s6416_s3 + $0x1a0] sm:$0xff]   ;;  %v2613_v32 = vsel %vm5850_vm0, %v4227_v9, %v2612_v22  ;;  %v2616_v27 = vsel %vm5850_vm0, %v2614_v44, %v2615_v15  ;;  %v1578_v33 = vld [vmem:[#allocation2 + $0x30] sm:$0xe] }
 0x193   : > { %4844 = vmatprep.subr.bf16.mxu1 %v5160_v21  ;;  %4703 = vmatmul.mubr.bf16.gmra.mrb[24].mxu0 %v4104_v54  ;;  %v5986_v36 = vsel %vm5850_vm0, %v4120_v5, %v1624_v30  ;;  %v1631_v1 = vrot.slane %v5707_v63, 5  ;;  %v4108_v49 = vcombine.low %v5814_v14, %v5816_v59  ;;  %v1634_v57 = vrot.slane %v5716_v18, 5  ;;  %v5172_v9 = vld [vmem:[%s6416_s3 + $0x1a8] sm:$0xff]   ;;  %v5175_v18 = vld [vmem:[%s6416_s3 + $0xb0] sm:$0xff]   ;;  %v5178_v5 = vld [vmem:[%s6416_s3 + $0x1b8] sm:$0xff]  }
 0x194   : > { %4719 = vmatpush3.bf16.msra.mxu0 %v5163_v7  ;;  %4706 = vmatprep.mubr.bf16.mxu0 %v4105_v2  ;;  %v5990_v41 = vsel %vm5850_vm0, %v1626_v39, %v1627_v51  ;;  %v4250_v2 = vcombine.low %v2606_v6, %v2609_v0  ;;  %v4251_v22 = vcombine.low %v2613_v32, %v2616_v27  ;;  %v1617_v20 = vrot.slane %v5221_v19, 5  ;;  %v6439_v51 = vld [vmem:[#allocation4_spill] sm:$0xff] }
 0x195   : > { %4720 = vmatprep.subr.bf16.mxu0 %v5165_v11  ;;  %v4144_v7 = vcombine.low %v5986_v36, %v5990_v41  ;;  %v1604_v63 = vsel %vm5850_vm0, %v4117_v55, %v1603_v50  ;;  %v1633_v14 = vrot.slane %v1631_v1, 4  ;;  %v1607_v15 = vsel %vm5850_vm0, %v1605_v13, %v1606_v10  ;;  %v5177_v10 = vld [vmem:[%s6416_s3 + $0xb8] sm:$0xff]   ;;  %v6114_v19 = vld [vmem:[#allocation2 + $0x20] sm:$0x1]  ;;  %v3083_v41 = vld [vmem:[#allocation2 + $0x30] sm:$0xf] }
 0x196   : > { %4845 = vmatpush3.bf16.msra.mxu1 %v5160_v21  ;;  %v5967_v21 = vld [vmem:[#allocation2 + $0xc] sm:$0xe]  ;;  %v1638_v43 = vrot.slane %v5747_v35, 5  ;;  %v1641_v50 = vrot.slane %v6438_v12, 5  ;;  %v2620_v35 = vsel %vm5850_vm0, %v4228_v16, %v2619_v53  ;;  %v2623_v62 = vsel %vm5850_vm0, %v5951_v25, %v2622_v48  ;;  %v1580_v25 = vld [vmem:[#allocation2 + $0x48] sm:$0xe] }
 0x197   : > { %4846 = vmatprep.subr.bf16.mxu1 %v5164_v58  ;;  %v4118_v54 = vrot.slane %v5967_v21, 9  ;;  %v6024_v3 = vsel %vm5850_vm0, %v1633_v14, %v1634_v57  ;;  %v4141_v46 = vcombine.low %v1604_v63, %v1607_v15  ;;  %v1619_v53 = vrot.slane %v1617_v20, 4  ;;  %v5182_v57 = vld [vmem:[%s6416_s3 + $0x1c0] sm:$0xff]   ;;  %v3077_v63 = vld [vmem:[#allocation2 + $0x18] sm:$0xf]  ;;  %v5186_v14 = vld [vmem:[%s6416_s3 + $0xd0] sm:$0xff]  }
 0x198   : > { %4721 = vmatpush3.bf16.msra.mxu0 %v5165_v11  ;;  %v1612_v11 = vrot.slane %v1610_v31, 4  ;;  %v1640_v30 = vrot.slane %v1638_v43, 4  ;;  %v1645_v23 = vrot.slane %v5789_v61, 5  ;;  %v4123_v61 = vrot.slane %v1580_v25, 9  ;;  %v5189_v15 = vld [vmem:[%s6416_s3 + $0xd8] sm:$0xff]  }
 0x199   : > { %4831 = vmatmul.mubr.bf16.gmra.mrb[4].mxu1 %v4248_v17  ;;  %4722 = vmatprep.subr.bf16.mxu0 %v5169_v47  ;;  %v4119_v17 = vrot.slane %v5982_v37, 9  ;;  %v1652_v0 = vrot.slane %v5816_v59, 5  ;;  %v4124_v27 = vrot.slane %v1581_v24, 9  ;;  %v5180_v59 = vld [vmem:[%s6416_s3 + $0xc0] sm:$0xff]  }
 0x19a   : > { %4847 = vmatpush3.bf16.msra.mxu1 %v5164_v58  ;;  %4834 = vmatprep.mubr.bf16.mxu1 %v4249_v29  ;;  %v4121_v58 = vrot.slane %v1578_v33, 9  ;;  %v4122_v29 = vrot.slane %v1579_v34, 9  ;;  %v6048_v13 = vsel %vm5850_vm0, %v1640_v30, %v1641_v50  ;;  %v1647_v21 = vrot.slane %v1645_v23, 4 }
 0x19b   : > { %4848 = vmatprep.subr.bf16.mxu1 %v5166_v4  ;;  %4707 = vmatmul.mubr.bf16.gmra.mrb[28].mxu0 %v4106_v40  ;;  %v1648_v40 = vrot.slane %v6439_v51, 5  ;;  %v1614_v39 = vsel %vm5850_vm0, %v1612_v11, %v1613_v60  ;;  %v1618_v6 = vsel %vm5850_vm0, %v4119_v17, %v1617_v20  ;;  %v6076_v45 = vsel %vm5850_vm0, %v4123_v61, %v1645_v23  ;;  %v5183_v11 = vld [vmem:[%s6416_s3 + $0xc8] sm:$0xff]   ;;  %v3080_v20 = vld [vmem:[#allocation2 + $0x24] sm:$0xf] }
 0x19c   : > { %4723 = vmatpush3.bf16.msra.mxu0 %v5169_v47  ;;  %4710 = vmatprep.mubr.bf16.mxu0 %v4107_v56  ;;  %v5222_v47 = vld [vmem:[#allocation2 + $0x20] sm:$0x1]  ;;  %v6044_v16 = vsel %vm5850_vm0, %v4122_v29, %v1638_v43  ;;  %v1611_v56 = vsel %vm5850_vm0, %v4118_v54, %v1610_v31  ;;  %v1655_v31 = vrot.slane %v5824_v52, 5  ;;  %v1654_v37 = vrot.slane %v1652_v0, 4  ;;  %v6118_v17 = vld [vmem:[#allocation2 + $0x28] sm:$0xf] }
 0x19d   : > { %4724 = vmatprep.subr.bf16.mxu0 %v5171_v28  ;;  %v1620_v44 = vrot.slane %v5222_v47, 5  ;;  %v4146_v48 = vcombine.low %v6044_v16, %v6048_v13  ;;  %v6080_v60 = vsel %vm5850_vm0, %v1647_v21, %v1648_v40  ;;  %v4142_v54 = vcombine.low %v1611_v56, %v1614_v39  ;;  %v5187_v29 = vld [vmem:[#allocation2 + $0x3c] sm:$0xff]   ;;  %v5198_v16 = vld [vmem:[%s6416_s3 + $0xf0] sm:$0xff]  }
 0x19e   : > { %4849 = vmatpush3.bf16.msra.mxu1 %v5166_v4  ;;  %v6020_v4 = vsel %vm5850_vm0, %v4121_v58, %v1631_v1  ;;  %v4147_v52 = vcombine.low %v6076_v45, %v6080_v60  ;;  %v6089_v1 = vsel %vm5850_vm0, %v4124_v27, %v1652_v0  ;;  %v5184_v58 = vld [vmem:[%s6416_s3 + $0x1c8] sm:$0xff]   ;;  %v3102_v34 = vshrl.u32 %v3077_v63, 16  ;;  %v5194_v21 = vld [vmem:[%s6416_s3 + $0x1e0] sm:$0xff]  }
 0x19f   : > { %4850 = vmatprep.subr.bf16.mxu1 %v5170_v42  ;;  %v4145_v55 = vcombine.low %v6020_v4, %v6024_v3  ;;  %v1621_v32 = vsel %vm5850_vm0, %v1619_v53, %v1620_v44  ;;  %v3105_v43 = vshll.u32 %v3077_v63, 16  ;;  %v3129_v47 = vshll.u32 %v3080_v20, 16  ;;  %v5191_v44 = vld [vmem:[#allocation2 + $0x48] sm:$0xff]  }
 0x1a0   : > { %4725 = vmatpush3.bf16.msra.mxu0 %v5171_v28  ;;  %v4252_v28 = vcombine.low %v2620_v35, %v2623_v62  ;;  %v5188_v35 = vld [vmem:[%s6416_s3 + $0x1d0] sm:$0xff]   ;;  %v3121_v30 = vshll.u32 %v6114_v19, 16  ;;  %v5190_v62 = vld [vmem:[%s6416_s3 + $0x1d8] sm:$0xff]   ;;  %v3135_v53 = vshll.u32 %v6118_v17, 16  ;;  %v3139_v36 = vshrl.u32 %v6118_v17, 16  ;;  %v5196_v63 = vld [vmem:[%s6416_s3 + $0x1e8] sm:$0xff]  }
 0x1a1   : > { %4835 = vmatmul.mubr.bf16.gmra.mrb[8].mxu1 %v4250_v2  ;;  %4726 = vmatprep.subr.bf16.mxu0 %v5175_v18  ;;  %v4143_v2 = vcombine.low %v1618_v6, %v1621_v32  ;;  %v3104_v23 = vrot.slane %v3102_v34, 4  ;;  %v6142_v4 = vld [vmem:[#allocation2 + $0x2c] sm:$0x1]  ;;  %v3150_v40 = vshrl.u32 %v3083_v41, 16 }
 0x1a2   : > { %4851 = vmatpush3.bf16.msra.mxu1 %v5170_v42  ;;  %4838 = vmatprep.mubr.bf16.mxu1 %v4251_v22  ;;  %v5179_v42 = vld [vmem:[#allocation2 + $0x18] sm:$0xff]   ;;  %v5185_v22 = vld [vmem:[#allocation2 + $0x30] sm:$0xff]   ;;  %v6152_v39 = vrot.slane %v3135_v53, 5  ;;  %v3141_v6 = vrot.slane %v3139_v36, 4  ;;  %v6154_v24 = vrot.slane %v3121_v30, 5  ;;  %v3145_v0 = vshll.u32 %v6142_v4, 16 }
 0x1a3   : > { %4852 = vmatprep.subr.bf16.mxu1 %v5172_v9  ;;  %4711 = vmatmul.mubr.bf16.gmra.mrb[32].mxu0 %v4108_v49  ;;  %v6093_v49 = vsel %vm5850_vm0, %v1654_v37, %v1655_v31  ;;  %v3086_v31 = vld [vmem:[#allocation2 + $0x3c] sm:$0xf]  ;;  %v6158_v37 = vld [vmem:[#allocation2 + $0x40] sm:$0xf]  ;;  %v6179_v34 = vld [vmem:[#allocation2 + $0x4c] sm:$0xf] }
 0x1a4   : > { %4727 = vmatpush3.bf16.msra.mxu0 %v5175_v18  ;;  %4730 = vmatprep.mubr.bf16.mxu0 %v4141_v46  ;;  %v4148_v33 = vcombine.low %v6089_v1, %v6093_v49  ;;  %v6109_v18 = vld [vmem:[#allocation2 + $0x1c] sm:$0xf]  ;;  %v5192_v46 = vld [vmem:[%s6416_s3 + $0xe0] sm:$0xff]   ;;  %v3142_v13 = vor.u32 %v3141_v6, %v6152_v39 }
 0x1a5   : > { %4728 = vmatprep.subr.bf16.mxu0 %v5177_v10  ;;  %v3111_v12 = vshll.u32 %v6109_v18, 16  ;;  %v3115_v50 = vshrl.u32 %v6109_v18, 16  ;;  %v6197_v36 = vld [vmem:[#allocation2 + $0x44] sm:$0x1]  ;;  %v5202_v1 = vld [vmem:[%s6416_s3 + $0x1f8] sm:$0xff]  }
 0x1a6   : > { %4853 = vmatpush3.bf16.msra.mxu1 %v5172_v9  ;;  %v5181_v9 = vld [vmem:[#allocation2 + $0x24] sm:$0xff]   ;;  %v6193_v30 = vrot.slane %v3142_v13, 4 }
 0x1a7   : > { %4854 = vmatprep.subr.bf16.mxu1 %v5176_v38  ;;  %v6140_v25 = vrot.slane %v3111_v12, 5  ;;  %v3117_v51 = vrot.slane %v3115_v50, 4 }
 0x1a8   : > { %4729 = vmatpush3.bf16.msra.mxu0 %v5177_v10  ;;  %v3126_v10 = vshrl.u32 %v3080_v20, 16  ;;  %v3089_v20 = vld [vmem:[#allocation2 + $0x48] sm:$0xf] }
 0x1a9   : > { %4839 = vmatmul.mubr.bf16.gmra.mrb[12].mxu1 %v4252_v28  ;;  %4746 = vmatprep.subr.bf16.mxu0 %v5180_v59  ;;  %v3153_v28 = vshll.u32 %v3083_v41, 16  ;;  %v3118_v27 = vor.u32 %v3117_v51, %v6140_v25  ;;  %v3198_v12 = vshrl.u32 %v3089_v20, 16  ;;  %v3201_v50 = vshll.u32 %v3089_v20, 16 }
 0x1aa   : > { %4855 = vmatpush3.bf16.msra.mxu1 %v5176_v38  ;;  %4858 = vmatprep.mubr.bf16.mxu1 %v5179_v42  ;;  %v3107_v38 = vrot.slane %v3105_v43, 5  ;;  %v3128_v3 = vrot.slane %v3126_v10, 4  ;;  %v5193_v42 = vld [vmem:[#allocation2 + $0x54] sm:$0xff]   ;;  %v6183_v43 = vrot.slane %v3145_v0, 5 }
 0x1ab   : > { %4856 = vmatprep.subr.bf16.mxu1 %v5178_v5  ;;  %4731 = vmatmul.mubr.bf16.vlgmr.msra.gmra.mrb[20].mxu0 %v4142_v54  ;;  %v5197_v54 = vld [vmem:[#allocation2 + $0x60] sm:$0xff]   ;;  %v3119_v60 = vrot.slane %v3118_v27, 4  ;;  %v5200_v10 = vld [vmem:[%s6416_s3 + $0x1f0] sm:$0xff]   ;;  %v6215_v27 = vld [vmem:[#allocation2 + $0x58] sm:$0xf] }
 0x1ac   : > { %4747 = vmatpush3.bf16.msra.mxu0 %v5180_v59  ;;  %4734 = vmatprep.mubr.bf16.mxu0 %v4143_v2  ;;  %v3108_v32 = vor.u32 %v3107_v38, %v3104_v23  ;;  %v6163_v2 = vld [vmem:[#allocation2 + $0x38] sm:$0x1]  ;;  %v3092_v0 = vld [vmem:[#allocation2 + $0x54] sm:$0xf]  ;;  %v3235_v20 = vshrl.u32 %v6215_v27, 16 }
 0x1ad   : > { %4748 = vmatprep.subr.bf16.mxu0 %v5183_v11  ;;  %v3169_v53 = vshll.u32 %v6163_v2, 16  ;;  %v3225_v13 = vshll.u32 %v3092_v0, 16 }
 0x1ae   : > { %4857 = vmatpush3.bf16.msra.mxu1 %v5178_v5  ;;  %v5195_v5 = vld [vmem:[%s6416_s3 + $0xe8] sm:$0xff]   ;;  %v3109_v45 = vrot.slane %v3108_v32, 4 }
 0x1af   : > { %4874 = vmatprep.subr.bf16.mxu1 %v5182_v57 }
 0x1b0   : > { %4749 = vmatpush3.bf16.msra.mxu0 %v5183_v11  ;;  %v3152_v11 = vrot.slane %v3150_v40, 4  ;;  %v3124_v40 = vsel %vm5595_vm13, %v3119_v60, %v6154_v24 }
 0x1b1   : > { %4859 = vmatmul.mubr.bf16.vlgmr.msra.gmra.mrb[0].mxu1 %v5181_v9  ;;  %4750 = vmatprep.subr.bf16.mxu0 %v5186_v14 }
 0x1b2   : > { %4875 = vmatpush3.bf16.msra.mxu1 %v5182_v57  ;;  %4862 = vmatprep.mubr.bf16.mxu1 %v5185_v22  ;;  %v3155_v57 = vrot.slane %v3153_v28, 5  ;;  %v6207_v28 = vld [vmem:[#allocation2 + $0x50] sm:$0x1] }
 0x1b3   : > { %4876 = vmatprep.subr.bf16.mxu1 %v5184_v58  ;;  %4735 = vmatmul.mubr.bf16.gmra.mrb[24].mxu0 %v4144_v7  ;;  %v6138_v7 = vld [vmem:[#allocation2 + $0x34] sm:$0xf] }
 0x1b4   : > { %4751 = vmatpush3.bf16.msra.mxu0 %v5186_v14  ;;  %4738 = vmatprep.mubr.bf16.mxu0 %v4145_v55  ;;  %v3131_v55 = vrot.slane %v3129_v47, 5  ;;  %v3159_v56 = vshll.u32 %v6138_v7, 16  ;;  %v3163_v61 = vshrl.u32 %v6138_v7, 16  ;;  %v3183_v14 = vshll.u32 %v6158_v37, 16  ;;  %v5201_v47 = vld [vmem:[%s6416_s3 + $0xf8] sm:$0xff]  }
 0x1b5   : > { %4752 = vmatprep.subr.bf16.mxu0 %v5189_v15 }
 0x1b6   : > { %4877 = vmatpush3.bf16.msra.mxu1 %v5184_v58  ;;  %v3132_v59 = vor.u32 %v3131_v55, %v3128_v3  ;;  %v6165_v9 = vrot.slane %v3159_v56, 5  ;;  %v3165_v22 = vrot.slane %v3163_v61, 4  ;;  %v3177_v58 = vshll.u32 %v3086_v31, 16  ;;  %v5199_v3 = vld [vmem:[#allocation2 + $0x6c] sm:$0xff]  }
 0x1b7   : > { %4878 = vmatprep.subr.bf16.mxu1 %v5188_v35  ;;  %v6199_v38 = vrot.slane %v3183_v14, 5  ;;  %v3114_v55 = vsel %vm5595_vm13, %v3109_v45, %v6140_v25  ;;  %v3200_v56 = vrot.slane %v3198_v12, 4  ;;  %v3203_v61 = vrot.slane %v3201_v50, 5  ;;  %v5205_v45 = vld [vmem:[%s6416_s3 + $0x200] sm:$0xff]  }
 0x1b8   : > { %4753 = vmatpush3.bf16.msra.mxu0 %v5189_v15  ;;  %v3187_v15 = vshrl.u32 %v6158_v37, 16  ;;  %v3179_v23 = vrot.slane %v3177_v58, 5  ;;  %v3193_v25 = vshll.u32 %v6197_v36, 16  ;;  %v4309_v24 = vcombine.low %v3114_v55, %v3124_v40 }
 0x1b9   : > { %4863 = vmatmul.mubr.bf16.gmra.mrb[4].mxu1 %v5187_v29  ;;  %4754 = vmatprep.subr.bf16.mxu0 %v5192_v46  ;;  %v3207_v29 = vshll.u32 %v6179_v34, 16 }
 0x1ba   : > { %4879 = vmatpush3.bf16.msra.mxu1 %v5188_v35  ;;  %4866 = vmatprep.mubr.bf16.mxu1 %v5191_v44  ;;  %v3211_v35 = vshrl.u32 %v6179_v34, 16  ;;  %v5203_v44 = vld [vmem:[#allocation2 + $0xc] sm:$0xff]   ;;  %v3189_v51 = vrot.slane %v3187_v15, 4  ;;  %v3195_v14 = vrot.slane %v3193_v25, 5  ;;  %v3231_v15 = vshll.u32 %v6215_v27, 16 }
 0x1bb   : > { %4880 = vmatprep.subr.bf16.mxu1 %v5190_v62  ;;  %4739 = vmatmul.mubr.bf16.gmra.mrb[28].mxu0 %v4146_v48  ;;  %v3174_v48 = vshrl.u32 %v3086_v31, 16 }
 0x1bc   : > { %4755 = vmatpush3.bf16.msra.mxu0 %v5192_v46  ;;  %4742 = vmatprep.mubr.bf16.mxu0 %v4147_v52  ;;  %v6181_v52 = vrot.slane %v3132_v59, 4  ;;  %v3166_v46 = vor.u32 %v3165_v22, %v6165_v9  ;;  %v3190_v59 = vor.u32 %v3189_v51, %v6199_v38  ;;  %v3204_v22 = vor.u32 %v3203_v61, %v3200_v56  ;;  %v3098_v61 = vld [vmem:[#allocation2 + $0x6c] sm:$0xf] }
 0x1bd   : > { %4756 = vmatprep.subr.bf16.mxu0 %v5195_v5  ;;  %v3176_v41 = vrot.slane %v3174_v48, 4  ;;  %v6231_v48 = vld [vmem:[#allocation2 + $0x64] sm:$0xf] }
 0x1be   : > { %4881 = vmatpush3.bf16.msra.mxu1 %v5190_v62  ;;  %v3156_v62 = vor.u32 %v3155_v57, %v3152_v11  ;;  %v3167_v31 = vrot.slane %v3166_v46, 4  ;;  %v3138_v49 = vsel %vm5595_vm13, %v6181_v52, %v6152_v39  ;;  %v3095_v11 = vld [vmem:[#allocation2 + $0x60] sm:$0xf]  ;;  %v5204_v57 = vld [vmem:[#allocation2 + $0x18] sm:$0xff]   ;;  %v5207_v39 = vld [vmem:[#allocation2 + $0x24] sm:$0xff]   ;;  %v3191_v50 = vrot.slane %v3190_v59, 4 }
 0x1bf   : > { %4882 = vmatprep.subr.bf16.mxu1 %v5194_v21  ;;  %v3180_v32 = vor.u32 %v3179_v23, %v3176_v41  ;;  %v3249_v12 = vshll.u32 %v3095_v11, 16  ;;  %v3237_v41 = vrot.slane %v3235_v20, 4  ;;  %v5206_v23 = vld [vmem:[%s6416_s3 + $0x208] sm:$0xff]   ;;  %v3273_v59 = vshll.u32 %v3098_v61, 16 }
 0x1c0   : > { %4757 = vmatpush3.bf16.msra.mxu0 %v5195_v5  ;;  %v3213_v5 = vrot.slane %v3211_v35, 4  ;;  %v3157_v6 = vrot.slane %v3156_v62, 4  ;;  %v3255_v35 = vshll.u32 %v6231_v48, 16  ;;  %v3227_v62 = vrot.slane %v3225_v13, 5 }
 0x1c1   : > { %4867 = vmatmul.mubr.bf16.gmra.mrb[8].mxu1 %v5193_v42  ;;  %4758 = vmatprep.subr.bf16.mxu0 %v5198_v16  ;;  %v3171_v42 = vrot.slane %v3169_v53, 5  ;;  %v3181_v52 = vrot.slane %v3180_v32, 4  ;;  %v6247_v53 = vrot.slane %v3231_v15, 5  ;;  %v3251_v55 = vrot.slane %v3249_v12, 5 }
 0x1c2   : > { %4883 = vmatpush3.bf16.msra.mxu1 %v5194_v21  ;;  %4870 = vmatprep.mubr.bf16.mxu1 %v5197_v54  ;;  %v6212_v21 = vrot.slane %v3207_v29, 5  ;;  %v3217_v54 = vshll.u32 %v6207_v28, 16  ;;  %v3162_v58 = vsel %vm5595_vm13, %v3157_v6, %v6165_v9  ;;  %v6243_v29 = vld [vmem:[#allocation2 + $0x5c] sm:$0x1]  ;;  %v6252_v40 = vrot.slane %v3255_v35, 5  ;;  %v5208_v6 = vld [vmem:[#allocation2 + $0x30] sm:$0xff]  }
 0x1c3   : > { %4884 = vmatprep.subr.bf16.mxu1 %v5196_v63  ;;  %4743 = vmatmul.mubr.bf16.gmra.mrb[32].mxu0 %v4148_v33  ;;  %v3148_v33 = vsel %vm5595_vm13, %v6193_v30, %v6183_v43  ;;  %v3172_v60 = vsel %vm5595_vm13, %v3167_v31, %v3171_v42  ;;  %v3246_v43 = vshrl.u32 %v3095_v11, 16  ;;  %v3186_v25 = vsel %vm5595_vm13, %v3181_v52, %v6199_v38  ;;  %v6262_v31 = vld [vmem:[#allocation2 + $0x68] sm:$0x1]  ;;  %v5211_v42 = vld [vmem:[#allocation2 + $0x3c] sm:$0xff]  }
 0x1c4   : > { %4759 = vmatpush3.bf16.msra.mxu0 %v5198_v16  ;;  %4762 = vmatprep.mubr.bf16.mxu0 %v5203_v44  ;;  %v3222_v16 = vshrl.u32 %v3092_v0, 16  ;;  %v3219_v9 = vrot.slane %v3217_v54, 5  ;;  %v4310_v46 = vcombine.low %v3138_v49, %v3148_v33  ;;  %v4311_v51 = vcombine.low %v3162_v58, %v3172_v60  ;;  %v5210_v52 = vld [vmem:[%s6416_s3 + $0x218] sm:$0xff]   ;;  %v5212_v35 = vld [vmem:[#allocation2 + $0x48] sm:$0xff]  }
 0x1c5   : > { %4760 = vmatprep.subr.bf16.mxu0 %v5201_v47  ;;  %v3196_v0 = vsel %vm5595_vm13, %v3191_v50, %v3195_v14  ;;  %v3238_v33 = vor.u32 %v3237_v41, %v6247_v53  ;;  %v3270_v38 = vshrl.u32 %v3098_v61, 16  ;;  %v3275_v20 = vrot.slane %v3273_v59, 5  ;;  %v5213_v41 = vld [vmem:[%s6416_s3 + $0x220] sm:$0xff]  }
 0x1c6   : > { %4885 = vmatpush3.bf16.msra.mxu1 %v5196_v63  ;;  %v3214_v63 = vor.u32 %v3213_v5, %v6212_v21  ;;  %v3224_v30 = vrot.slane %v3222_v16, 4  ;;  %v6254_v5 = vld [vmem:[#allocation2 + $0x70] sm:$0xf]  ;;  %v4312_v16 = vcombine.low %v3186_v25, %v3196_v0  ;;  %v5214_v0 = vld [vmem:[%s6416_s3 + $0x228] sm:$0xff]   ;;  %v3504_v59 = vld [vmem:[#allocation2 + $0x24] sm:$0xe] }
 0x1c7   : > { %4886 = vmatprep.subr.bf16.mxu1 %v5200_v10  ;;  %v3279_v54 = vshll.u32 %v6254_v5, 16  ;;  %v3283_v11 = vshrl.u32 %v6254_v5, 16  ;;  %v3239_v58 = vrot.slane %v3238_v33, 4  ;;  %v3272_v15 = vrot.slane %v3270_v38, 4  ;;  %v5217_v33 = vld [vmem:[%s6416_s3 + $0x230] sm:$0xff]  }
 0x1c8   : > { %4761 = vmatpush3.bf16.msra.mxu0 %v5201_v47  ;;  %v3205_v47 = vrot.slane %v3204_v22, 4  ;;  %v3215_v44 = vrot.slane %v3214_v63, 4  ;;  %v3228_v49 = vor.u32 %v3227_v62, %v3224_v30  ;;  %v3265_v63 = vshll.u32 %v6262_v31, 16 }
 0x1c9   : > { %4871 = vmatmul.mubr.bf16.gmra.mrb[12].mxu1 %v5199_v3  ;;  %v3248_v3 = vrot.slane %v3246_v43, 4  ;;  %v3285_v60 = vrot.slane %v3283_v11, 4  ;;  %v3276_v30 = vor.u32 %v3275_v20, %v3272_v15  ;;  %v3505_v11 = vld [vmem:[#allocation2 + $0x30] sm:$0xe]  ;;  %v3506_v20 = vld [vmem:[#allocation2 + $0x3c] sm:$0xe] }
 0x1ca   : > { %4887 = vmatpush3.bf16.msra.mxu1 %v5200_v10  ;;  %4890 = vmatprep.mubr.bf16.mxu1 %v4309_v24  ;;  %v3259_v10 = vshrl.u32 %v6231_v48, 16  ;;  %v3241_v24 = vshll.u32 %v6243_v29, 16  ;;  %v3210_v32 = vsel %vm5595_vm13, %v3205_v47, %v6212_v21  ;;  %v3267_v50 = vrot.slane %v3265_v63, 5  ;;  %v5215_v47 = vld [vmem:[#allocation2 + $0x54] sm:$0xff]  }
 0x1cb   : > { %4888 = vmatprep.subr.bf16.mxu1 %v5202_v1  ;;  %4763 = vmatmul.mubr.bf16.vlgmr.msra.gmra.mrb[20].mxu0 %v5204_v57  ;;  %v5209_v57 = vld [vmem:[%s6416_s3 + $0x210] sm:$0xff]   ;;  %v3252_v21 = vor.u32 %v3251_v55, %v3248_v3  ;;  %v3503_v3 = vld [vmem:[#allocation2 + $0x18] sm:$0xe]  ;;  %v3277_v61 = vrot.slane %v3276_v30, 4 }
 0x1cc   : > { %4766 = vmatprep.mubr.bf16.mxu0 %v5207_v39  ;;  %v3261_v56 = vrot.slane %v3259_v10, 4  ;;  %v3229_v39 = vrot.slane %v3228_v49, 4  ;;  %v3243_v14 = vrot.slane %v3241_v24, 5  ;;  %v3544_v49 = vrot.slane %v6118_v17, 5  ;;  %v5218_v63 = vld [vmem:[%s6416_s3 + $0x238] sm:$0xff]  }
 0x1cd   : > { %v3253_v43 = vrot.slane %v3252_v21, 4  ;;  %v4326_v17 = vrot.slane %v3504_v59, 9 }
 0x1ce   : > { %4889 = vmatpush3.bf16.msra.mxu1 %v5202_v1  ;;  %v3220_v1 = vsel %vm5595_vm13, %v3215_v44, %v3219_v9  ;;  %v3262_v22 = vor.u32 %v3261_v56, %v6252_v40  ;;  %v6280_v9 = vld [vmem:[#allocation2 + $0x74] sm:$0x1]  ;;  %v3234_v10 = vsel %vm5595_vm13, %v3229_v39, %v6247_v53  ;;  %v3244_v44 = vsel %vm5595_vm13, %v3239_v58, %v3243_v14 }
 0x1cf   : > { %4906 = vmatprep.subr.bf16.mxu1 %v5205_v45  ;;  %v4313_v13 = vcombine.low %v3210_v32, %v3220_v1  ;;  %v4314_v55 = vcombine.low %v3234_v10, %v3244_v44  ;;  %v5216_v32 = vld [vmem:[#allocation2 + $0x60] sm:$0xff]   ;;  %v3546_v21 = vrot.slane %v3544_v49, 4  ;;  %v3554_v39 = vrot.slane %v6163_v2, 5 }
 0x1d0   : > { %v3263_v12 = vrot.slane %v3262_v22, 4  ;;  %v3547_v22 = vrot.slane %v6142_v4, 5  ;;  %v3558_v4 = vrot.slane %v6158_v37, 5  ;;  %v3565_v2 = vrot.slane %v6179_v34, 5 }
 0x1d1   : > { %4891 = vmatmul.mubr.bf16.vlgmr.msra.gmra.mrb[0].mxu1 %v4310_v46  ;;  %v3289_v46 = vshll.u32 %v6280_v9, 16  ;;  %v3568_v10 = vrot.slane %v6207_v28, 5  ;;  %v3572_v44 = vrot.slane %v6215_v27, 5  ;;  %v3509_v28 = vld [vmem:[#allocation2 + $0x60] sm:$0xe]  ;;  %v3582_v27 = vrot.slane %v6262_v31, 5 }
 0x1d2   : > { %4907 = vmatpush3.bf16.msra.mxu1 %v5205_v45  ;;  %4894 = vmatprep.mubr.bf16.mxu1 %v4311_v51  ;;  %v3281_v45 = vrot.slane %v3279_v54, 5  ;;  %v3268_v53 = vsel %vm5595_vm13, %v3263_v12, %v3267_v50  ;;  %v3537_v51 = vrot.slane %v6109_v18, 5  ;;  %v3551_v54 = vrot.slane %v6138_v7, 5 }
 0x1d3   : > { %4908 = vmatprep.subr.bf16.mxu1 %v5206_v23  ;;  %4767 = vmatmul.mubr.bf16.gmra.mrb[24].mxu0 %v5208_v6  ;;  %v3291_v25 = vrot.slane %v3289_v46, 5  ;;  %v3545_v7 = vsel %vm5850_vm0, %v4326_v17, %v3544_v49  ;;  %v3548_v58 = vsel %vm5850_vm0, %v3546_v21, %v3547_v22  ;;  %v3560_v12 = vrot.slane %v3558_v4, 4 }
 0x1d4   : > { %4770 = vmatprep.mubr.bf16.mxu0 %v5211_v42  ;;  %v3286_v62 = vor.u32 %v3285_v60, %v3281_v45  ;;  %v3539_v24 = vrot.slane %v3537_v51, 4  ;;  %v3540_v42 = vrot.slane %v6114_v19, 5  ;;  %v3282_v18 = vsel %vm5595_vm13, %v3277_v61, %v3281_v45  ;;  %v3507_v45 = vld [vmem:[#allocation2 + $0x48] sm:$0xe] }
 0x1d5   : > { %v4350_v60 = vcombine.low %v3545_v7, %v3548_v58  ;;  %v3561_v50 = vrot.slane %v6197_v36, 5  ;;  %v3567_v37 = vrot.slane %v3565_v2, 4  ;;  %v3579_v46 = vrot.slane %v6231_v48, 5 }
 0x1d6   : > { %4909 = vmatpush3.bf16.msra.mxu1 %v5206_v23  ;;  %v3258_v23 = vsel %vm5595_vm13, %v3253_v43, %v6252_v40  ;;  %v3287_v6 = vrot.slane %v3286_v62, 4  ;;  %v4325_v40 = vrot.slane %v3503_v3, 9  ;;  %v3541_v38 = vsel %vm5850_vm0, %v3539_v24, %v3540_v42  ;;  %v3508_v62 = vld [vmem:[#allocation2 + $0x54] sm:$0xe] }
 0x1d7   : > { %4910 = vmatprep.subr.bf16.mxu1 %v5209_v57  ;;  %v4315_v56 = vcombine.low %v3258_v23, %v3268_v53  ;;  %v4328_v43 = vrot.slane %v3506_v20, 9  ;;  %v3562_v34 = vsel %vm5850_vm0, %v3560_v12, %v3561_v50  ;;  %v3569_v36 = vsel %vm5850_vm0, %v3567_v37, %v3568_v10 }
 0x1d8   : > { %v3292_v1 = vsel %vm5595_vm13, %v3287_v6, %v3291_v25  ;;  %v3538_v19 = vsel %vm5850_vm0, %v4325_v40, %v3537_v51  ;;  %v4330_v53 = vrot.slane %v3508_v62, 9  ;;  %v3574_v51 = vrot.slane %v3572_v44, 4 }
 0x1d9   : > { %4895 = vmatmul.mubr.bf16.gmra.mrb[4].mxu1 %v4312_v16  ;;  %v4316_v26 = vcombine.low %v3282_v18, %v3292_v1  ;;  %v4327_v16 = vrot.slane %v3505_v11, 9  ;;  %v3575_v3 = vrot.slane %v6243_v29, 5  ;;  %v3586_v48 = vrot.slane %v6254_v5, 5 }
 0x1da   : > { %4911 = vmatpush3.bf16.msra.mxu1 %v5209_v57  ;;  %4898 = vmatprep.mubr.bf16.mxu1 %v4313_v13  ;;  %v4349_v57 = vcombine.low %v3538_v19, %v3541_v38  ;;  %v3553_v13 = vrot.slane %v3551_v54, 4  ;;  %v3573_v61 = vsel %vm5850_vm0, %v4330_v53, %v3572_v44 }
 0x1db   : > { %4912 = vmatprep.subr.bf16.mxu1 %v5210_v52  ;;  %4771 = vmatmul.mubr.bf16.gmra.mrb[28].mxu0 %v5212_v35  ;;  %v3552_v14 = vsel %vm5850_vm0, %v4327_v16, %v3551_v54  ;;  %v4329_v35 = vrot.slane %v3507_v45, 9  ;;  %v3576_v6 = vsel %vm5850_vm0, %v3574_v51, %v3575_v3  ;;  %v3588_v42 = vrot.slane %v3586_v48, 4 }
 0x1dc   : > { %4774 = vmatprep.mubr.bf16.mxu0 %v5215_v47  ;;  %v3555_v15 = vsel %vm5850_vm0, %v3553_v13, %v3554_v39  ;;  %v3559_v47 = vsel %vm5850_vm0, %v4328_v43, %v3558_v4  ;;  %v4354_v40 = vcombine.low %v3573_v61, %v3576_v6  ;;  %v6368_v39 = vld [vmem:[%s6417_s4] ss:$0 sm:$0xff] }
 0x1dd   : > { %v3566_v30 = vsel %vm5850_vm0, %v4329_v35, %v3565_v2 }
 0x1de   : > { %4913 = vmatpush3.bf16.msra.mxu1 %v5210_v52  ;;  %v4351_v52 = vcombine.low %v3552_v14, %v3555_v15  ;;  %v4353_v23 = vcombine.low %v3566_v30, %v3569_v36 }
 0x1df   : > { %4914 = vmatprep.subr.bf16.mxu1 %v5213_v41 }
 0x1e1   : > { %4899 = vmatmul.mubr.bf16.gmra.mrb[8].mxu1 %v4314_v55  ;;  %v4331_v55 = vrot.slane %v3509_v28, 9 }
 0x1e2   : > { %4915 = vmatpush3.bf16.msra.mxu1 %v5213_v41  ;;  %4902 = vmatprep.mubr.bf16.mxu1 %v4315_v56  ;;  %v4352_v41 = vcombine.low %v3559_v47, %v3562_v34  ;;  %v3581_v56 = vrot.slane %v3579_v46, 4 }
 0x1e3   : > { %4916 = vmatprep.subr.bf16.mxu1 %v5214_v0  ;;  %4775 = vmatmul.mubr.bf16.gmra.mrb[32].mxu0 %v5216_v32  ;;  %v3580_v25 = vsel %vm5850_vm0, %v4331_v55, %v3579_v46  ;;  %v3589_v32 = vrot.slane %v6280_v9, 5 }
 0x1e4   : > { %v3583_v29 = vsel %vm5850_vm0, %v3581_v56, %v3582_v27 }
 0x1e5   : > { %v4355_v24 = vcombine.low %v3580_v25, %v3583_v29  ;;  %v3590_v5 = vsel %vm5850_vm0, %v3588_v42, %v3589_v32 }
 0x1e6   : > { %4917 = vmatpush3.bf16.msra.mxu1 %v5214_v0  ;;  %v3510_v0 = vld [vmem:[#allocation2 + $0x6c] sm:$0xe] }
 0x1e7   : > { %4918 = vmatprep.subr.bf16.mxu1 %v5217_v33  ;;  %v4332_v31 = vrot.slane %v3510_v0, 9 }
 0x1e9   : > { %4903 = vmatmul.mubr.bf16.gmra.mrb[12].mxu1 %v4316_v26  ;;  %v3587_v18 = vsel %vm5850_vm0, %v4332_v31, %v3586_v48 }
 0x1ea   : > { %4919 = vmatpush3.bf16.msra.mxu1 %v5217_v33  ;;  %4922 = vmatprep.mubr.bf16.mxu1 %v4349_v57  ;;  %v4356_v1 = vcombine.low %v3587_v18, %v3590_v5 }
 0x1eb   : > { %4920 = vmatprep.subr.bf16.mxu1 %v5218_v63 }
 0x1ee   : > { %4921 = vmatpush3.bf16.msra.mxu1 %v5218_v63 }
 0x1f1   : > { %4923 = vmatmul.mubr.bf16.vlgmr.msra.gmra.mrb[0].mxu1 %v4350_v60 }
 0x1f2   : > { %4926 = vmatprep.mubr.bf16.mxu1 %v4351_v52 }
 0x1f9   : > { %4927 = vmatmul.mubr.bf16.gmra.mrb[4].mxu1 %v4352_v41 }
 0x1fa   : > { %4930 = vmatprep.mubr.bf16.mxu1 %v4353_v23 }
 0x201   : > { %4931 = vmatmul.mubr.bf16.gmra.mrb[8].mxu1 %v4354_v40 }
 0x202   : > { %4934 = vmatprep.mubr.bf16.mxu1 %v4355_v24 }
 0x209   : > { %4935 = vmatmul.mubr.bf16.gmra.mrb[12].mxu1 %v4356_v1 }
 0x29e   : > { %v4764_v49 = vpop.f32.mrb[20].mxu0 }
 0x29f   : > { %v2031_v33 = vpop.f32.mrb[21].mxu0 }
 0x2a0   : > { %v4765_v19 = vpop.f32.mrb[22].mxu0 }
 0x2a1   : > { %v2034_v38 = vpop.f32.mrb[23].mxu0 }
 0x2a6   : > { %v4768_v59 = vpop.f32.mrb[24].mxu0 }
 0x2a7   : > { %v2047_v54 = vpop.f32.mrb[25].mxu0 }
 0x2a8   : > { %v4769_v11 = vpop.f32.mrb[26].mxu0 }
 0x2a9   : > { %v2050_v26 = vpop.f32.mrb[27].mxu0 }
 0x2ae   : > { %v4772_v57 = vpop.f32.mrb[28].mxu0 }
 0x2af   : > { %v2063_v9 = vpop.f32.mrb[29].mxu0 }
 0x2b0   : > { %v4773_v17 = vpop.f32.mrb[30].mxu0 }
 0x2b1   : > { %v2066_v21 = vpop.f32.mrb[31].mxu0 }
 0x2b6   : > { %v6357_v22 = vpop.f32.mrb[32].mxu0 }
 0x2b7   : > { %v6359_v63 = vpop.f32.mrb[33].mxu0 }
 0x2b8   : > { %v6361_v8 = vpop.f32.mrb[34].mxu0 }
 0x2b9   : > { %v6363_v16 = vpop.f32.mrb[35].mxu0 }
 0x2c4   : > { %v4924_v13 = vpop.f32.mrb[0].mxu1 }
 0x2c5   : > { %v4938_v7 = vadd.f32 %v4924_v13, %v4764_v49  ;;  %v3722_v58 = vpop.f32.mrb[1].mxu1 }
 0x2c6   : > { %v4939_v4 = vadd.f32 %v3722_v58, %v2031_v33  ;;  %v4925_v14 = vpop.f32.mrb[2].mxu1 }
 0x2c7   : > { %v3810_v15 = vadd.f32 %v4938_v7, %v6368_v39  ;;  %v4940_v20 = vadd.f32 %v4925_v14, %v4765_v19  ;;  %v3725_v2 = vpop.f32.mrb[3].mxu1 }
 0x2c8   : > { %v3808_v45 = vadd.f32 %v4939_v4, %v6368_v39  ;;  %v4941_v60 = vadd.f32 %v3725_v2, %v2034_v38 }
 0x2c9   : > { %v3811_v52 = vadd.f32 %v4940_v20, %v6368_v39  ;;  %v3826_v12 = vmax.f32 %v3810_v15, 0.0 }
 0x2ca   : > { %v3809_v43 = vadd.f32 %v4941_v60, %v6368_v39  ;;  %v3824_v35 = vmax.f32 %v3808_v45, 0.0 }
 0x2cb   : > { %v3827_v50 = vmax.f32 %v3811_v52, 0.0 }
 0x2cc   : > { %v3825_v37 = vmax.f32 %v3809_v43, 0.0  ;;  %v4928_v10 = vpop.f32.mrb[4].mxu1 }
 0x2cd   : > { %v4428_v47 = vpack.c.bf16 %v3827_v50, %v3826_v12  ;;  %v4942_v34 = vadd.f32 %v4928_v10, %v4768_v59  ;;  %v3738_v44 = vpop.f32.mrb[5].mxu1 }
 0x2ce   : > { %v4423_v30 = vpack.c.bf16 %v3825_v37, %v3824_v35  ;;  %v4943_v36 = vadd.f32 %v3738_v44, %v2047_v54  ;;  %v4929_v62 = vpop.f32.mrb[6].mxu1 }
 0x2cf   : > { %4460 = vst [vmem:[%s5346_s16 + $0x8] sm:$0xff] %v4428_v47   ;;  %v3814_v46 = vadd.f32 %v4942_v34, %v6368_v39  ;;  %v4944_v28 = vadd.f32 %v4929_v62, %v4769_v11  ;;  %v3741_v41 = vpop.f32.mrb[7].mxu1 }
 0x2d0   : > { %4424 = vst [vmem:[%s5346_s16] sm:$0xff] %v4423_v30   ;;  %v3812_v23 = vadd.f32 %v4943_v36, %v6368_v39  ;;  %v4945_v53 = vadd.f32 %v3741_v41, %v2050_v26 }
 0x2d1   : > { %v3815_v51 = vadd.f32 %v4944_v28, %v6368_v39  ;;  %v3830_v55 = vmax.f32 %v3814_v46, 0.0 }
 0x2d2   : > { %v3813_v3 = vadd.f32 %v4945_v53, %v6368_v39  ;;  %v3828_v27 = vmax.f32 %v3812_v23, 0.0 }
 0x2d3   : > { %v3831_v56 = vmax.f32 %v3815_v51, 0.0 }
 0x2d4   : > { %v3829_v61 = vmax.f32 %v3813_v3, 0.0  ;;  %v4932_v6 = vpop.f32.mrb[8].mxu1 }
 0x2d5   : > { %v4438_v48 = vpack.c.bf16 %v3831_v56, %v3830_v55  ;;  %v4946_v25 = vadd.f32 %v4932_v6, %v4772_v57  ;;  %v3754_v29 = vpop.f32.mrb[9].mxu1 }
 0x2d6   : > { %v4433_v0 = vpack.c.bf16 %v3829_v61, %v3828_v27  ;;  %v4947_v40 = vadd.f32 %v3754_v29, %v2063_v9  ;;  %v4933_v24 = vpop.f32.mrb[10].mxu1 }
 0x2d7   : > { %4462 = vst [vmem:[%s5346_s16 + $0x18] sm:$0xff] %v4438_v48   ;;  %v3818_v31 = vadd.f32 %v4946_v25, %v6368_v39  ;;  %v4948_v42 = vadd.f32 %v4933_v24, %v4773_v17  ;;  %v3757_v32 = vpop.f32.mrb[11].mxu1 }
 0x2d8   : > { %4461 = vst [vmem:[%s5346_s16 + $0x10] sm:$0xff] %v4433_v0   ;;  %v3816_v18 = vadd.f32 %v4947_v40, %v6368_v39  ;;  %v4949_v5 = vadd.f32 %v3757_v32, %v2066_v21 }
 0x2d9   : > { %v3819_v1 = vadd.f32 %v4948_v42, %v6368_v39  ;;  %v3834_v33 = vmax.f32 %v3818_v31, 0.0 }
 0x2da   : > { %v3817_v49 = vadd.f32 %v4949_v5, %v6368_v39  ;;  %v3832_v38 = vmax.f32 %v3816_v18, 0.0 }
 0x2db   : > { %v3835_v19 = vmax.f32 %v3819_v1, 0.0 }
 0x2dc   : > { %v3833_v59 = vmax.f32 %v3817_v49, 0.0  ;;  %v4936_v54 = vpop.f32.mrb[12].mxu1 }
 0x2dd   : > { %v4448_v11 = vpack.c.bf16 %v3835_v19, %v3834_v33  ;;  %v4950_v26 = vadd.f32 %v4936_v54, %v6357_v22  ;;  %v3770_v57 = vpop.f32.mrb[13].mxu1 }
 0x2de   : > { %v4443_v9 = vpack.c.bf16 %v3833_v59, %v3832_v38  ;;  %v4951_v17 = vadd.f32 %v3770_v57, %v6359_v63  ;;  %v4937_v13 = vpop.f32.mrb[14].mxu1 }
 0x2df   : > { %4464 = vst [vmem:[%s5346_s16 + $0x28] sm:$0xff] %v4448_v11   ;;  %v3822_v21 = vadd.f32 %v4950_v26, %v6368_v39  ;;  %v4952_v7 = vadd.f32 %v4937_v13, %v6361_v8  ;;  %v3773_v58 = vpop.f32.mrb[15].mxu1 }
 0x2e0   : > { %4463 = vst [vmem:[%s5346_s16 + $0x20] sm:$0xff] %v4443_v9   ;;  %v3820_v4 = vadd.f32 %v4951_v17, %v6368_v39  ;;  %v4953_v14 = vadd.f32 %v3773_v58, %v6363_v16 }
 0x2e1   : > { %v3823_v22 = vadd.f32 %v4952_v7, %v6368_v39  ;;  %v3838_v20 = vmax.f32 %v3822_v21, 0.0 }
 0x2e2   : > { %v3821_v15 = vadd.f32 %v4953_v14, %v6368_v39  ;;  %v3836_v2 = vmax.f32 %v3820_v4, 0.0 }
 0x2e3   : > { %v3839_v63 = vmax.f32 %v3823_v22, 0.0 }
 0x2e4   : > { %v3837_v45 = vmax.f32 %v3821_v15, 0.0 }
 0x2e5   : > { %v4458_v60 = vpack.c.bf16 %v3839_v63, %v3838_v20 }
 0x2e6   : > { %v4453_v52 = vpack.c.bf16 %v3837_v45, %v3836_v2 }
 0x2e7   : > { %4466 = vst [vmem:[%s5346_s16 + $0x38] sm:$0xff] %v4458_v60  }
 0x2e8   : > { %4465 = vst [vmem:[%s5346_s16 + $0x30] sm:$0xff] %v4453_v52  }
 0x2e9 PF: > { %s15_s22 = sadd.s32 1, %s5261_s22   ;;  %s6440_s18 = smov %s5253_s20 }
 0x2ea   : > { %p12_p10 = scmp.ge.s32.totalorder %s15_s22, 6   ;;  %s6441_s19 = smov %s5257_s21 }
 0x2eb   : > { %s6442_s20 = smov %s6445_s23  ;;  %s6443_s21 = smov %s6449_s24 }
 0x2ec   :  { %14 = sbr.rel (!%p12_p10) target bundleno = 3 (0x3), region = 89 }

</bundles_post_ra>
